<compile_context>
chip_gen: v5e
topology: v5e:2x2
jax: 0.10.0
libtpu: 0.0.40
codegen_flags: <defaults>
</compile_context>

<pallas_src>
import functools

import jax
import jax.numpy as jnp
from jax import lax
from jax.experimental import pallas as pl
from jax.experimental.pallas import tpu as pltpu


# ---------------------------------------------------------------------------
# Model configuration (consistent with the PyTorch module's discriminator config)
# ---------------------------------------------------------------------------
N_MEL = 128                     # hard-coded in the PyTorch module
N_CHANNELS = [64, 128, 32]
KERNEL_SIZES = [3, 5, 3]
STRIDES = [1, 2, 1]
LRELU_SLOPE = 0.2


# ---------------------------------------------------------------------------
# Fused kernel: Linear -> conv0 -> conv1 -> (cond || uncond) head, all in VMEM.
# Activations are channels-first [C, Thp] with time on lanes; the stride-2 layer is
# handled by keeping even/odd time phases as separate (aligned) streams.
# ---------------------------------------------------------------------------
def _jcu_fused_kernel(
    x_ref, pw_ref, pb_ref, w0_ref, b0_ref,
    w1l_ref, w1c_ref, w1r_ref, b1_ref, wh_ref, bh_ref,
    f0_ref, f1_ref, fc_ref, fu_ref,
    *, n_e, n_o, slope):
  f32 = jnp.float32
  cdt = pw_ref.dtype                      # bf16 compute dtype for MXU operands
  thp = x_ref.shape[-1]                   # padded half-rate length (multiple of 128)
  n_1 = n_e                               # valid length after the stride-2 layer

  col = lax.broadcasted_iota(jnp.int32, (1, thp), 1)

  def mask(y, n):                         # zero the (padded) tail columns
    return jnp.where(col < n, y, 0.0)

  def act(y, n):                          # LeakyReLU(0.2) + tail mask (f32 epilogue)
    y = jnp.where(y >= 0.0, y, slope * y)
    return jnp.where(col < n, y, 0.0)

  def sr(m):                              # shift columns right by 1: out[:,u] = m[:,u-1]
    return pltpu.roll(m, shift=1, axis=1)

  def sl(m):                              # shift columns left by 1:  out[:,u] = m[:,u+1]
    return pltpu.roll(m, shift=thp - 1, axis=1)

  def mm(w, a):                           # MXU matmul, f32 accumulation
    return jnp.dot(w, a, preferred_element_type=f32)

  # ---- input_projection: Linear(128 -> 256), weight-as-LHS, per phase -------
  pw = pw_ref[...]
  pb = pb_ref[...]
  a0e = mask(mm(pw, x_ref[0]) + pb, n_e).astype(cdt)        # [256, Thp] even frames
  a0o = mask(mm(pw, x_ref[1]) + pb, n_o).astype(cdt)        # [256, Thp] odd frames

  # ---- conv_block[0]: K=3, S=1, 256 -> 64, LeakyReLU(0.2), polyphase --------
  # even outputs t=2u read A0[2u-1], A0[2u], A0[2u+1]; odd outputs read 2u, 2u+1, 2u+2.
  w00, w01, w02 = w0_ref[0], w0_ref[1], w0_ref[2]
  b0 = b0_ref[...]
  y0e = sr(mm(w00, a0o)) + mm(w01, a0e) + mm(w02, a0o) + b0
  y0o = mm(w00, a0e) + mm(w01, a0o) + sl(mm(w02, a0e)) + b0
  a1e = act(y0e, n_e)                                       # [64, Thp]
  a1o = act(y0o, n_o)
  f0_ref[0] = a1e.astype(f0_ref.dtype)                      # phase-split feature map
  f0_ref[1] = a1o.astype(f0_ref.dtype)
  a1e_c = a1e.astype(cdt)
  a1o_c = a1o.astype(cdt)
  a1 = jnp.concatenate([a1e_c, a1o_c], axis=0)              # [128, Thp] (even||odd channels)

  # ---- conv_block[1]: K=5, S=2, 64 -> 128 -- taps pre-folded to 3 matmuls ----
  # output t1 reads A1 at 2t1-2..2t1+2  ==  phases e[t1-1], o[t1-1], e[t1], o[t1], e[t1+1]
  y1 = (sr(mm(w1l_ref[...], a1)) + mm(w1c_ref[...], a1)
        + sl(mm(w1r_ref[...], a1e_c)) + b1_ref[...])
  a2 = act(y1, n_1)                                         # [128, Thp]
  f1_ref[...] = a2.astype(f1_ref.dtype)
  a2c = a2.astype(cdt)

  # ---- cond_conv_block[0] (++) uncond_conv_block[0], fused along C_out -------
  yh = (sr(mm(wh_ref[0], a2c)) + mm(wh_ref[1], a2c)
        + sl(mm(wh_ref[2], a2c)) + bh_ref[...])
  h = act(yh, n_1)                                          # [64, Thp]
  half = fc_ref.shape[0]
  fc_ref[...] = h[0:half].astype(fc_ref.dtype)              # cond head   [32, Thp]
  fu_ref[...] = h[half:2 * half].astype(fu_ref.dtype)       # uncond head [32, Thp]


# ---------------------------------------------------------------------------
# Forward pass wrapper
# ---------------------------------------------------------------------------
def jcu_discriminator_forward(params, x_ts, *, compute_dtype=jnp.bfloat16,
                              feature_dtype=jnp.bfloat16):
  """x_ts: [B, T, 128] -> (cond_feats, uncond_feats), lists of NCW [B, C, T']."""
  B, T, H = x_ts.shape
  assert H == N_MEL
  K0, K1, KH = KERNEL_SIZES
  assert (K0, K1, KH) == (3, 5, 3) and tuple(STRIDES) == (1, 2, 1)
  C0, C1, CH = N_CHANNELS                                   # 64, 128, 32

  n_e = (T + 1) // 2                                        # even-phase valid length (== T1)
  n_o = T // 2                                              # odd-phase valid length
  t1 = n_e                                                  # PyTorch: (T + 2*2 - 5)//2 + 1
  # Pad time to a multiple of 256 (so the half-rate lane width Thp = Tp//2 is a multiple
  # of 128 -> lane-dense stores) with >= 2 frames of slack so halo reads past T are zero.
  tp = pl.cdiv(T + 2, 256) * 256
  thp = tp // 2

  cd = compute_dtype
  f32 = jnp.float32

  # input: [B, T, 128] -> zero-pad time -> even/odd phase split, channels-first.
  # (one tiny XLA transpose of the smallest tensor; replaces all in-kernel transposes)
  x_pad = jnp.pad(x_ts, ((0, 0), (0, tp - T), (0, 0)))
  x_ph = jnp.transpose(x_pad.reshape(B, thp, 2, H), (0, 2, 3, 1)).astype(cd)  # [B,2,128,Thp]

  # weights in weight-as-LHS layout [C_out, C_in]; conv taps pre-split / pre-folded.
  pw = params["proj_w"].astype(cd)                          # [256, 128]
  pb = params["proj_b"].reshape(-1, 1).astype(f32)          # [256, 1]
  w0 = jnp.transpose(params["conv0_w"], (2, 0, 1)).astype(cd)       # [3, 64, 256]
  b0 = params["conv0_b"].reshape(-1, 1).astype(f32)
  w1 = params["conv1_w"]                                    # [128, 64, 5]
  w1l = jnp.concatenate([w1[:, :, 0], w1[:, :, 1]], axis=1).astype(cd)   # [128, 128]
  w1c = jnp.concatenate([w1[:, :, 2], w1[:, :, 3]], axis=1).astype(cd)   # [128, 128]
  w1r = w1[:, :, 4].astype(cd)                                           # [128, 64]
  b1 = params["conv1_b"].reshape(-1, 1).astype(f32)
  # fuse the two 32-channel heads (they share their input) into one 64-channel conv
  wh = jnp.transpose(
      jnp.concatenate([params["cond_w"], params["uncond_w"]], axis=0),
      (2, 0, 1)).astype(cd)                                 # [3, 64, 128]
  bh = jnp.concatenate([params["cond_b"], params["uncond_b"]]).reshape(-1, 1).astype(f32)

  kernel = functools.partial(_jcu_fused_kernel, n_e=n_e, n_o=n_o, slope=LRELU_SLOPE)

  # TODO(synk): add a time-tile (and v7x second parallel) grid axis with phase-aware
  # halos for very long T (8k+ frames) or B == 1 on v7x; typical TTS T (~1k) fits easily.
  f0_ph, f1, fc, fu = pl.pallas_call(
      kernel,
      out_shape=(
          jax.ShapeDtypeStruct((B, 2, C0, thp), feature_dtype),
          jax.ShapeDtypeStruct((B, C1, thp), feature_dtype),
          jax.ShapeDtypeStruct((B, CH, thp), feature_dtype),
          jax.ShapeDtypeStruct((B, CH, thp), feature_dtype),
      ),
      grid=(B,),
      in_specs=[
          pl.BlockSpec((None, 2, H, thp), lambda b: (b, 0, 0, 0)),
          pl.BlockSpec((2 * N_MEL, N_MEL), lambda b: (0, 0)),
          pl.BlockSpec((2 * N_MEL, 1), lambda b: (0, 0)),
          pl.BlockSpec((K0, C0, 2 * N_MEL), lambda b: (0, 0, 0)),
          pl.BlockSpec((C0, 1), lambda b: (0, 0)),
          pl.BlockSpec((C1, 2 * C0), lambda b: (0, 0)),
          pl.BlockSpec((C1, 2 * C0), lambda b: (0, 0)),
          pl.BlockSpec((C1, C0), lambda b: (0, 0)),
          pl.BlockSpec((C1, 1), lambda b: (0, 0)),
          pl.BlockSpec((KH, 2 * CH, C1), lambda b: (0, 0, 0)),
          pl.BlockSpec((2 * CH, 1), lambda b: (0, 0)),
      ],
      out_specs=(
          pl.BlockSpec((None, 2, C0, thp), lambda b: (b, 0, 0, 0)),
          pl.BlockSpec((None, C1, thp), lambda b: (b, 0, 0)),
          pl.BlockSpec((None, CH, thp), lambda b: (b, 0, 0)),
          pl.BlockSpec((None, CH, thp), lambda b: (b, 0, 0)),
      ),
      compiler_params=pltpu.CompilerParams(
          dimension_semantics=("parallel",),
          vmem_limit_bytes=32 * 1024 * 1024,    # safe on v7x's 64 MiB physical VMEM
      ),
  )(x_ph, pw, pb, w0, b0, w1l, w1c, w1r, b1, wh, bh)

  # re-interleave the phase-split conv_block[0] feature map to PyTorch NCW [B, 64, T]
  f0 = jnp.transpose(f0_ph, (0, 2, 3, 1)).reshape(B, C0, tp)[:, :, :T]
  f1 = f1[:, :, :t1]
  fc = fc[:, :, :t1]
  fu = fu[:, :, :t1]

  # TODO(synk): multi_speaker speaker_emb branch and the unused self.mlp / spk_mlp
  # are not built -- forward(x_ts) receives neither diffusion-step nor speaker input.
  cond_feats = [f0, f1, fc]
  uncond_feats = [f0, f1, fu]
  return cond_feats, uncond_feats


# ---------------------------------------------------------------------------
# Parameters (synthetic; ConvNorm weights_init uses normal(0, 0.02)); torch layouts.
# ---------------------------------------------------------------------------
def init_params(key):
  ks = jax.random.split(key, 10)
  n = lambda k, shape: 0.02 * jax.random.normal(k, shape, jnp.float32)
  return {
      "proj_w": n(ks[0], (2 * N_MEL, N_MEL)),       # nn.Linear weight [out, in]
      "proj_b": n(ks[1], (2 * N_MEL,)),
      "conv0_w": n(ks[2], (N_CHANNELS[0], 2 * N_MEL, KERNEL_SIZES[0])),   # [O, I, K]
      "conv0_b": n(ks[3], (N_CHANNELS[0],)),
      "conv1_w": n(ks[4], (N_CHANNELS[1], N_CHANNELS[0], KERNEL_SIZES[1])),
      "conv1_b": n(ks[5], (N_CHANNELS[1],)),
      "cond_w": n(ks[6], (N_CHANNELS[2], N_CHANNELS[1], KERNEL_SIZES[2])),
      "cond_b": n(ks[7], (N_CHANNELS[2],)),
      "uncond_w": n(ks[8], (N_CHANNELS[2], N_CHANNELS[1], KERNEL_SIZES[2])),
      "uncond_b": n(ks[9], (N_CHANNELS[2],)),
  }


# ---------------------------------------------------------------------------
# Pure-JAX reference with matched bf16/f32 numerics (for correctness checking)
# ---------------------------------------------------------------------------
def ref_forward(params, x_ts, *, compute_dtype=jnp.bfloat16):
  cd = compute_dtype
  f32 = jnp.float32

  def conv_lrelu(h, w, b, stride, pad):       # h [B, C, T]; w [O, I, K]
    y = lax.conv_general_dilated(
        h.astype(cd), w.astype(cd), window_strides=(stride,),
        padding=[(pad, pad)], dimension_numbers=("NCW", "OIW", "NCW"),
        preferred_element_type=f32)
    y = y + b[None, :, None]
    return jnp.where(y >= 0.0, y, LRELU_SLOPE * y)

  x = jnp.dot(x_ts.astype(cd), params["proj_w"].T.astype(cd),
              preferred_element_type=f32) + params["proj_b"]
  x = jnp.transpose(x, (0, 2, 1))             # NCW [B, 256, T]

  h0 = conv_lrelu(x, params["conv0_w"], params["conv0_b"], 1, 1)
  h1 = conv_lrelu(h0, params["conv1_w"], params["conv1_b"], 2, 2)
  hc = conv_lrelu(h1, params["cond_w"], params["cond_b"], 1, 1)
  hu = conv_lrelu(h1, params["uncond_w"], params["uncond_b"], 1, 1)
  return [h0, h1, hc], [h0, h1, hu]


# ---------------------------------------------------------------------------
if __name__ == "__main__":
  key = jax.random.PRNGKey(0)
  k_param, k_x = jax.random.split(key)

  B, T = 2, 16
  x_ts = jax.random.normal(k_x, (B, T, N_MEL), jnp.float32)
  params = init_params(k_param)

  fwd = jax.jit(jcu_discriminator_forward)
  cond_feats, uncond_feats = jax.block_until_ready(fwd(params, x_ts))

  ref_cond, ref_uncond = ref_forward(params, x_ts)
  for got, want in zip(list(cond_feats) + list(uncond_feats),
                       list(ref_cond) + list(ref_uncond)):
    assert got.shape == want.shape, (got.shape, want.shape)
    err = float(jnp.max(jnp.abs(got.astype(jnp.float32) - want)))
    assert err < 2e-2, err

  print("KERNEL_OK")
</pallas_src>

<mosaic_0001>
module attributes {stable_mosaic.version = 11 : i64} {
  func.func @_jcu_fused_kernel(%arg0: i32, %arg1: memref<1x2x128x128xbf16, #tpu.memory_space<vmem>>, %arg2: memref<256x128xbf16, #tpu.memory_space<vmem>>, %arg3: memref<256x1xf32, #tpu.memory_space<vmem>>, %arg4: memref<3x64x256xbf16, #tpu.memory_space<vmem>>, %arg5: memref<64x1xf32, #tpu.memory_space<vmem>>, %arg6: memref<128x128xbf16, #tpu.memory_space<vmem>>, %arg7: memref<128x128xbf16, #tpu.memory_space<vmem>>, %arg8: memref<128x64xbf16, #tpu.memory_space<vmem>>, %arg9: memref<128x1xf32, #tpu.memory_space<vmem>>, %arg10: memref<3x64x128xbf16, #tpu.memory_space<vmem>>, %arg11: memref<64x1xf32, #tpu.memory_space<vmem>>, %arg12: memref<1x2x64x128xbf16, #tpu.memory_space<vmem>>, %arg13: memref<1x128x128xbf16, #tpu.memory_space<vmem>>, %arg14: memref<1x32x128xbf16, #tpu.memory_space<vmem>>, %arg15: memref<1x32x128xbf16, #tpu.memory_space<vmem>>) attributes {dimension_semantics = [#tpu.dimension_semantics<parallel>], iteration_bounds = array<i64: 2>, scalar_prefetch = 0 : i64, scratch_operands = 0 : i64, tpu.core_type = #tpu.core_type<tc>, window_params = [{transform_indices = @transform_0, window_bounds = array<i64: 1, 2, 128, 128>}, {pipeline_mode = #tpu.pipeline_mode<synchronous>, transform_indices = @transform_1, window_bounds = array<i64: 256, 128>}, {pipeline_mode = #tpu.pipeline_mode<synchronous>, transform_indices = @transform_2, window_bounds = array<i64: 256, 1>}, {pipeline_mode = #tpu.pipeline_mode<synchronous>, transform_indices = @transform_3, window_bounds = array<i64: 3, 64, 256>}, {pipeline_mode = #tpu.pipeline_mode<synchronous>, transform_indices = @transform_4, window_bounds = array<i64: 64, 1>}, {pipeline_mode = #tpu.pipeline_mode<synchronous>, transform_indices = @transform_5, window_bounds = array<i64: 128, 128>}, {pipeline_mode = #tpu.pipeline_mode<synchronous>, transform_indices = @transform_6, window_bounds = array<i64: 128, 128>}, {pipeline_mode = #tpu.pipeline_mode<synchronous>, transform_indices = @transform_7, window_bounds = array<i64: 128, 64>}, {pipeline_mode = #tpu.pipeline_mode<synchronous>, transform_indices = @transform_8, window_bounds = array<i64: 128, 1>}, {pipeline_mode = #tpu.pipeline_mode<synchronous>, transform_indices = @transform_9, window_bounds = array<i64: 3, 64, 128>}, {pipeline_mode = #tpu.pipeline_mode<synchronous>, transform_indices = @transform_10, window_bounds = array<i64: 64, 1>}, {transform_indices = @transform_11, window_bounds = array<i64: 1, 2, 64, 128>}, {transform_indices = @transform_12, window_bounds = array<i64: 1, 128, 128>}, {transform_indices = @transform_13, window_bounds = array<i64: 1, 32, 128>}, {transform_indices = @transform_14, window_bounds = array<i64: 1, 32, 128>}]} {
    %0 = tpu.iota {dimensions = array<i32: 1>} : vector<1x128xi32>
    %c0 = arith.constant 0 : index
    %c0_0 = arith.constant 0 : index
    %1 = vector.load %arg2[%c0, %c0_0] : memref<256x128xbf16, #tpu.memory_space<vmem>>, vector<256x128xbf16>
    %c0_1 = arith.constant 0 : index
    %c0_2 = arith.constant 0 : index
    %2 = vector.load %arg3[%c0_1, %c0_2] : memref<256x1xf32, #tpu.memory_space<vmem>>, vector<256x1xf32>
    %c0_3 = arith.constant 0 : index
    %c0_4 = arith.constant 0 : index
    %c0_5 = arith.constant 0 : index
    %c0_6 = arith.constant 0 : index
    %3 = vector.load %arg1[%c0_3, %c0_4, %c0_5, %c0_6] : memref<1x2x128x128xbf16, #tpu.memory_space<vmem>>, vector<1x1x128x128xbf16>
    %4 = vector.shape_cast %3 : vector<1x1x128x128xbf16> to vector<128x128xbf16>
    %cst = arith.constant dense<0.000000e+00> : vector<256x128xf32>
    %5 = tpu.matmul %1, %4, %cst {dimension_numbers = #tpu.dot_dimension_numbers<[1], [0], [0], [1], [0, 0, 1, 1], [], []>} : vector<256x128xbf16>, vector<128x128xbf16>, vector<256x128xf32> -> vector<256x128xf32>
    %6 = vector.broadcast %2 : vector<256x1xf32> to vector<256x128xf32>
    %7 = arith.addf %5, %6 : vector<256x128xf32>
    %c8_i32 = arith.constant 8 : i32
    %8 = vector.broadcast %c8_i32 : i32 to vector<1x128xi32>
    %9 = arith.cmpi slt, %0, %8 : vector<1x128xi32>
    %cst_7 = arith.constant 0.000000e+00 : f32
    %10 = vector.shape_cast %9 : vector<1x128xi1> to vector<1x128xi1>
    %11 = vector.broadcast %10 : vector<1x128xi1> to vector<256x128xi1>
    %12 = vector.broadcast %cst_7 : f32 to vector<256x128xf32>
    %13 = arith.select %11, %7, %12 : vector<256x128xi1>, vector<256x128xf32>
    %14 = arith.truncf %13 : vector<256x128xf32> to vector<256x128xbf16>
    %c0_8 = arith.constant 0 : index
    %c1 = arith.constant 1 : index
    %c0_9 = arith.constant 0 : index
    %c0_10 = arith.constant 0 : index
    %15 = vector.load %arg1[%c0_8, %c1, %c0_9, %c0_10] : memref<1x2x128x128xbf16, #tpu.memory_space<vmem>>, vector<1x1x128x128xbf16>
    %16 = vector.shape_cast %15 : vector<1x1x128x128xbf16> to vector<128x128xbf16>
    %cst_11 = arith.constant dense<0.000000e+00> : vector<256x128xf32>
    %17 = tpu.matmul %1, %16, %cst_11 {dimension_numbers = #tpu.dot_dimension_numbers<[1], [0], [0], [1], [0, 0, 1, 1], [], []>} : vector<256x128xbf16>, vector<128x128xbf16>, vector<256x128xf32> -> vector<256x128xf32>
    %18 = vector.broadcast %2 : vector<256x1xf32> to vector<256x128xf32>
    %19 = arith.addf %17, %18 : vector<256x128xf32>
    %c8_i32_12 = arith.constant 8 : i32
    %20 = vector.broadcast %c8_i32_12 : i32 to vector<1x128xi32>
    %21 = arith.cmpi slt, %0, %20 : vector<1x128xi32>
    %cst_13 = arith.constant 0.000000e+00 : f32
    %22 = vector.shape_cast %21 : vector<1x128xi1> to vector<1x128xi1>
    %23 = vector.broadcast %22 : vector<1x128xi1> to vector<256x128xi1>
    %24 = vector.broadcast %cst_13 : f32 to vector<256x128xf32>
    %25 = arith.select %23, %19, %24 : vector<256x128xi1>, vector<256x128xf32>
    %26 = arith.truncf %25 : vector<256x128xf32> to vector<256x128xbf16>
    %c0_14 = arith.constant 0 : index
    %c0_15 = arith.constant 0 : index
    %c0_16 = arith.constant 0 : index
    %27 = vector.load %arg4[%c0_14, %c0_15, %c0_16] : memref<3x64x256xbf16, #tpu.memory_space<vmem>>, vector<1x64x256xbf16>
    %28 = vector.shape_cast %27 : vector<1x64x256xbf16> to vector<64x256xbf16>
    %c1_17 = arith.constant 1 : index
    %c0_18 = arith.constant 0 : index
    %c0_19 = arith.constant 0 : index
    %29 = vector.load %arg4[%c1_17, %c0_18, %c0_19] : memref<3x64x256xbf16, #tpu.memory_space<vmem>>, vector<1x64x256xbf16>
    %30 = vector.shape_cast %29 : vector<1x64x256xbf16> to vector<64x256xbf16>
    %c2 = arith.constant 2 : index
    %c0_20 = arith.constant 0 : index
    %c0_21 = arith.constant 0 : index
    %31 = vector.load %arg4[%c2, %c0_20, %c0_21] : memref<3x64x256xbf16, #tpu.memory_space<vmem>>, vector<1x64x256xbf16>
    %32 = vector.shape_cast %31 : vector<1x64x256xbf16> to vector<64x256xbf16>
    %c0_22 = arith.constant 0 : index
    %c0_23 = arith.constant 0 : index
    %33 = vector.load %arg5[%c0_22, %c0_23] : memref<64x1xf32, #tpu.memory_space<vmem>>, vector<64x1xf32>
    %cst_24 = arith.constant dense<0.000000e+00> : vector<64x128xf32>
    %34 = tpu.matmul %28, %26, %cst_24 {dimension_numbers = #tpu.dot_dimension_numbers<[1], [0], [0], [1], [0, 0, 1, 1], [], []>} : vector<64x256xbf16>, vector<256x128xbf16>, vector<64x128xf32> -> vector<64x128xf32>
    %c1_i32 = arith.constant 1 : i32
    %35 = tpu.dynamic_rotate %34 by %c1_i32 dim 1 : vector<64x128xf32>, i32 -> vector<64x128xf32>
    %cst_25 = arith.constant dense<0.000000e+00> : vector<64x128xf32>
    %36 = tpu.matmul %30, %14, %cst_25 {dimension_numbers = #tpu.dot_dimension_numbers<[1], [0], [0], [1], [0, 0, 1, 1], [], []>} : vector<64x256xbf16>, vector<256x128xbf16>, vector<64x128xf32> -> vector<64x128xf32>
    %37 = arith.addf %35, %36 : vector<64x128xf32>
    %cst_26 = arith.constant dense<0.000000e+00> : vector<64x128xf32>
    %38 = tpu.matmul %32, %26, %cst_26 {dimension_numbers = #tpu.dot_dimension_numbers<[1], [0], [0], [1], [0, 0, 1, 1], [], []>} : vector<64x256xbf16>, vector<256x128xbf16>, vector<64x128xf32> -> vector<64x128xf32>
    %39 = arith.addf %37, %38 : vector<64x128xf32>
    %40 = vector.broadcast %33 : vector<64x1xf32> to vector<64x128xf32>
    %41 = arith.addf %39, %40 : vector<64x128xf32>
    %cst_27 = arith.constant dense<0.000000e+00> : vector<64x128xf32>
    %42 = tpu.matmul %28, %14, %cst_27 {dimension_numbers = #tpu.dot_dimension_numbers<[1], [0], [0], [1], [0, 0, 1, 1], [], []>} : vector<64x256xbf16>, vector<256x128xbf16>, vector<64x128xf32> -> vector<64x128xf32>
    %cst_28 = arith.constant dense<0.000000e+00> : vector<64x128xf32>
    %43 = tpu.matmul %30, %26, %cst_28 {dimension_numbers = #tpu.dot_dimension_numbers<[1], [0], [0], [1], [0, 0, 1, 1], [], []>} : vector<64x256xbf16>, vector<256x128xbf16>, vector<64x128xf32> -> vector<64x128xf32>
    %44 = arith.addf %42, %43 : vector<64x128xf32>
    %cst_29 = arith.constant dense<0.000000e+00> : vector<64x128xf32>
    %45 = tpu.matmul %32, %14, %cst_29 {dimension_numbers = #tpu.dot_dimension_numbers<[1], [0], [0], [1], [0, 0, 1, 1], [], []>} : vector<64x256xbf16>, vector<256x128xbf16>, vector<64x128xf32> -> vector<64x128xf32>
    %c127_i32 = arith.constant 127 : i32
    %46 = tpu.dynamic_rotate %45 by %c127_i32 dim 1 : vector<64x128xf32>, i32 -> vector<64x128xf32>
    %47 = arith.addf %44, %46 : vector<64x128xf32>
    %48 = vector.broadcast %33 : vector<64x1xf32> to vector<64x128xf32>
    %49 = arith.addf %47, %48 : vector<64x128xf32>
    %cst_30 = arith.constant 0.000000e+00 : f32
    %50 = vector.broadcast %cst_30 : f32 to vector<64x128xf32>
    %51 = arith.cmpf oge, %41, %50 : vector<64x128xf32>
    %cst_31 = arith.constant 2.000000e-01 : f32
    %52 = vector.broadcast %cst_31 : f32 to vector<64x128xf32>
    %53 = arith.mulf %52, %41 : vector<64x128xf32>
    %54 = arith.select %51, %41, %53 : vector<64x128xi1>, vector<64x128xf32>
    %c8_i32_32 = arith.constant 8 : i32
    %55 = vector.broadcast %c8_i32_32 : i32 to vector<1x128xi32>
    %56 = arith.cmpi slt, %0, %55 : vector<1x128xi32>
    %cst_33 = arith.constant 0.000000e+00 : f32
    %57 = vector.shape_cast %56 : vector<1x128xi1> to vector<1x128xi1>
    %58 = vector.broadcast %57 : vector<1x128xi1> to vector<64x128xi1>
    %59 = vector.broadcast %cst_33 : f32 to vector<64x128xf32>
    %60 = arith.select %58, %54, %59 : vector<64x128xi1>, vector<64x128xf32>
    %cst_34 = arith.constant 0.000000e+00 : f32
    %61 = vector.broadcast %cst_34 : f32 to vector<64x128xf32>
    %62 = arith.cmpf oge, %49, %61 : vector<64x128xf32>
    %cst_35 = arith.constant 2.000000e-01 : f32
    %63 = vector.broadcast %cst_35 : f32 to vector<64x128xf32>
    %64 = arith.mulf %63, %49 : vector<64x128xf32>
    %65 = arith.select %62, %49, %64 : vector<64x128xi1>, vector<64x128xf32>
    %c8_i32_36 = arith.constant 8 : i32
    %66 = vector.broadcast %c8_i32_36 : i32 to vector<1x128xi32>
    %67 = arith.cmpi slt, %0, %66 : vector<1x128xi32>
    %cst_37 = arith.constant 0.000000e+00 : f32
    %68 = vector.shape_cast %67 : vector<1x128xi1> to vector<1x128xi1>
    %69 = vector.broadcast %68 : vector<1x128xi1> to vector<64x128xi1>
    %70 = vector.broadcast %cst_37 : f32 to vector<64x128xf32>
    %71 = arith.select %69, %65, %70 : vector<64x128xi1>, vector<64x128xf32>
    %72 = arith.truncf %60 : vector<64x128xf32> to vector<64x128xbf16>
    %c0_38 = arith.constant 0 : index
    %c0_39 = arith.constant 0 : index
    %c0_40 = arith.constant 0 : index
    %c0_41 = arith.constant 0 : index
    %73 = vector.load %arg12[%c0_38, %c0_39, %c0_40, %c0_41] : memref<1x2x64x128xbf16, #tpu.memory_space<vmem>>, vector<1x1x64x128xbf16>
    %74 = vector.shape_cast %73 : vector<1x1x64x128xbf16> to vector<64x128xbf16>
    %75 = vector.shape_cast %72 : vector<64x128xbf16> to vector<1x1x64x128xbf16>
    tpu.vector_store %arg12[%c0_38, %c0_39, %c0_40, %c0_41], %75 {strides = array<i32>} : memref<1x2x64x128xbf16, #tpu.memory_space<vmem>>, vector<1x1x64x128xbf16>,
    %76 = arith.truncf %71 : vector<64x128xf32> to vector<64x128xbf16>
    %c0_42 = arith.constant 0 : index
    %c1_43 = arith.constant 1 : index
    %c0_44 = arith.constant 0 : index
    %c0_45 = arith.constant 0 : index
    %77 = vector.load %arg12[%c0_42, %c1_43, %c0_44, %c0_45] : memref<1x2x64x128xbf16, #tpu.memory_space<vmem>>, vector<1x1x64x128xbf16>
    %78 = vector.shape_cast %77 : vector<1x1x64x128xbf16> to vector<64x128xbf16>
    %79 = vector.shape_cast %76 : vector<64x128xbf16> to vector<1x1x64x128xbf16>
    tpu.vector_store %arg12[%c0_42, %c1_43, %c0_44, %c0_45], %79 {strides = array<i32>} : memref<1x2x64x128xbf16, #tpu.memory_space<vmem>>, vector<1x1x64x128xbf16>,
    %80 = arith.truncf %60 : vector<64x128xf32> to vector<64x128xbf16>
    %81 = arith.truncf %71 : vector<64x128xf32> to vector<64x128xbf16>
    %82 = tpu.concatenate %80, %81 in 0 : vector<64x128xbf16>, vector<64x128xbf16> -> vector<128x128xbf16>
    %c0_46 = arith.constant 0 : index
    %c0_47 = arith.constant 0 : index
    %83 = vector.load %arg6[%c0_46, %c0_47] : memref<128x128xbf16, #tpu.memory_space<vmem>>, vector<128x128xbf16>
    %cst_48 = arith.constant dense<0.000000e+00> : vector<128x128xf32>
    %84 = tpu.matmul %83, %82, %cst_48 {dimension_numbers = #tpu.dot_dimension_numbers<[1], [0], [0], [1], [0, 0, 1, 1], [], []>} : vector<128x128xbf16>, vector<128x128xbf16>, vector<128x128xf32> -> vector<128x128xf32>
    %c1_i32_49 = arith.constant 1 : i32
    %85 = tpu.dynamic_rotate %84 by %c1_i32_49 dim 1 : vector<128x128xf32>, i32 -> vector<128x128xf32>
    %c0_50 = arith.constant 0 : index
    %c0_51 = arith.constant 0 : index
    %86 = vector.load %arg7[%c0_50, %c0_51] : memref<128x128xbf16, #tpu.memory_space<vmem>>, vector<128x128xbf16>
    %cst_52 = arith.constant dense<0.000000e+00> : vector<128x128xf32>
    %87 = tpu.matmul %86, %82, %cst_52 {dimension_numbers = #tpu.dot_dimension_numbers<[1], [0], [0], [1], [0, 0, 1, 1], [], []>} : vector<128x128xbf16>, vector<128x128xbf16>, vector<128x128xf32> -> vector<128x128xf32>
    %88 = arith.addf %85, %87 : vector<128x128xf32>
    %c0_53 = arith.constant 0 : index
    %c0_54 = arith.constant 0 : index
    %89 = vector.load %arg8[%c0_53, %c0_54] : memref<128x64xbf16, #tpu.memory_space<vmem>>, vector<128x64xbf16>
    %cst_55 = arith.constant dense<0.000000e+00> : vector<128x128xf32>
    %90 = tpu.matmul %89, %80, %cst_55 {dimension_numbers = #tpu.dot_dimension_numbers<[1], [0], [0], [1], [0, 0, 1, 1], [], []>} : vector<128x64xbf16>, vector<64x128xbf16>, vector<128x128xf32> -> vector<128x128xf32>
    %c127_i32_56 = arith.constant 127 : i32
    %91 = tpu.dynamic_rotate %90 by %c127_i32_56 dim 1 : vector<128x128xf32>, i32 -> vector<128x128xf32>
    %92 = arith.addf %88, %91 : vector<128x128xf32>
    %c0_57 = arith.constant 0 : index
    %c0_58 = arith.constant 0 : index
    %93 = vector.load %arg9[%c0_57, %c0_58] : memref<128x1xf32, #tpu.memory_space<vmem>>, vector<128x1xf32>
    %94 = vector.broadcast %93 : vector<128x1xf32> to vector<128x128xf32>
    %95 = arith.addf %92, %94 : vector<128x128xf32>
    %cst_59 = arith.constant 0.000000e+00 : f32
    %96 = vector.broadcast %cst_59 : f32 to vector<128x128xf32>
    %97 = arith.cmpf oge, %95, %96 : vector<128x128xf32>
    %cst_60 = arith.constant 2.000000e-01 : f32
    %98 = vector.broadcast %cst_60 : f32 to vector<128x128xf32>
    %99 = arith.mulf %98, %95 : vector<128x128xf32>
    %100 = arith.select %97, %95, %99 : vector<128x128xi1>, vector<128x128xf32>
    %c8_i32_61 = arith.constant 8 : i32
    %101 = vector.broadcast %c8_i32_61 : i32 to vector<1x128xi32>
    %102 = arith.cmpi slt, %0, %101 : vector<1x128xi32>
    %cst_62 = arith.constant 0.000000e+00 : f32
    %103 = vector.shape_cast %102 : vector<1x128xi1> to vector<1x128xi1>
    %104 = vector.broadcast %103 : vector<1x128xi1> to vector<128x128xi1>
    %105 = vector.broadcast %cst_62 : f32 to vector<128x128xf32>
    %106 = arith.select %104, %100, %105 : vector<128x128xi1>, vector<128x128xf32>
    %107 = arith.truncf %106 : vector<128x128xf32> to vector<128x128xbf16>
    %c0_63 = arith.constant 0 : index
    %c0_64 = arith.constant 0 : index
    %c0_65 = arith.constant 0 : index
    %108 = vector.load %arg13[%c0_63, %c0_64, %c0_65] : memref<1x128x128xbf16, #tpu.memory_space<vmem>>, vector<1x128x128xbf16>
    %109 = vector.shape_cast %108 : vector<1x128x128xbf16> to vector<128x128xbf16>
    %110 = vector.shape_cast %107 : vector<128x128xbf16> to vector<1x128x128xbf16>
    tpu.vector_store %arg13[%c0_63, %c0_64, %c0_65], %110 {strides = array<i32>} : memref<1x128x128xbf16, #tpu.memory_space<vmem>>, vector<1x128x128xbf16>,
    %111 = arith.truncf %106 : vector<128x128xf32> to vector<128x128xbf16>
    %c0_66 = arith.constant 0 : index
    %c0_67 = arith.constant 0 : index
    %c0_68 = arith.constant 0 : index
    %112 = vector.load %arg10[%c0_66, %c0_67, %c0_68] : memref<3x64x128xbf16, #tpu.memory_space<vmem>>, vector<1x64x128xbf16>
    %113 = vector.shape_cast %112 : vector<1x64x128xbf16> to vector<64x128xbf16>
    %cst_69 = arith.constant dense<0.000000e+00> : vector<64x128xf32>
    %114 = tpu.matmul %113, %111, %cst_69 {dimension_numbers = #tpu.dot_dimension_numbers<[1], [0], [0], [1], [0, 0, 1, 1], [], []>} : vector<64x128xbf16>, vector<128x128xbf16>, vector<64x128xf32> -> vector<64x128xf32>
    %c1_i32_70 = arith.constant 1 : i32
    %115 = tpu.dynamic_rotate %114 by %c1_i32_70 dim 1 : vector<64x128xf32>, i32 -> vector<64x128xf32>
    %c1_71 = arith.constant 1 : index
    %c0_72 = arith.constant 0 : index
    %c0_73 = arith.constant 0 : index
    %116 = vector.load %arg10[%c1_71, %c0_72, %c0_73] : memref<3x64x128xbf16, #tpu.memory_space<vmem>>, vector<1x64x128xbf16>
    %117 = vector.shape_cast %116 : vector<1x64x128xbf16> to vector<64x128xbf16>
    %cst_74 = arith.constant dense<0.000000e+00> : vector<64x128xf32>
    %118 = tpu.matmul %117, %111, %cst_74 {dimension_numbers = #tpu.dot_dimension_numbers<[1], [0], [0], [1], [0, 0, 1, 1], [], []>} : vector<64x128xbf16>, vector<128x128xbf16>, vector<64x128xf32> -> vector<64x128xf32>
    %119 = arith.addf %115, %118 : vector<64x128xf32>
    %c2_75 = arith.constant 2 : index
    %c0_76 = arith.constant 0 : index
    %c0_77 = arith.constant 0 : index
    %120 = vector.load %arg10[%c2_75, %c0_76, %c0_77] : memref<3x64x128xbf16, #tpu.memory_space<vmem>>, vector<1x64x128xbf16>
    %121 = vector.shape_cast %120 : vector<1x64x128xbf16> to vector<64x128xbf16>
    %cst_78 = arith.constant dense<0.000000e+00> : vector<64x128xf32>
    %122 = tpu.matmul %121, %111, %cst_78 {dimension_numbers = #tpu.dot_dimension_numbers<[1], [0], [0], [1], [0, 0, 1, 1], [], []>} : vector<64x128xbf16>, vector<128x128xbf16>, vector<64x128xf32> -> vector<64x128xf32>
    %c127_i32_79 = arith.constant 127 : i32
    %123 = tpu.dynamic_rotate %122 by %c127_i32_79 dim 1 : vector<64x128xf32>, i32 -> vector<64x128xf32>
    %124 = arith.addf %119, %123 : vector<64x128xf32>
    %c0_80 = arith.constant 0 : index
    %c0_81 = arith.constant 0 : index
    %125 = vector.load %arg11[%c0_80, %c0_81] : memref<64x1xf32, #tpu.memory_space<vmem>>, vector<64x1xf32>
    %126 = vector.broadcast %125 : vector<64x1xf32> to vector<64x128xf32>
    %127 = arith.addf %124, %126 : vector<64x128xf32>
    %cst_82 = arith.constant 0.000000e+00 : f32
    %128 = vector.broadcast %cst_82 : f32 to vector<64x128xf32>
    %129 = arith.cmpf oge, %127, %128 : vector<64x128xf32>
    %cst_83 = arith.constant 2.000000e-01 : f32
    %130 = vector.broadcast %cst_83 : f32 to vector<64x128xf32>
    %131 = arith.mulf %130, %127 : vector<64x128xf32>
    %132 = arith.select %129, %127, %131 : vector<64x128xi1>, vector<64x128xf32>
    %c8_i32_84 = arith.constant 8 : i32
    %133 = vector.broadcast %c8_i32_84 : i32 to vector<1x128xi32>
    %134 = arith.cmpi slt, %0, %133 : vector<1x128xi32>
    %cst_85 = arith.constant 0.000000e+00 : f32
    %135 = vector.shape_cast %134 : vector<1x128xi1> to vector<1x128xi1>
    %136 = vector.broadcast %135 : vector<1x128xi1> to vector<64x128xi1>
    %137 = vector.broadcast %cst_85 : f32 to vector<64x128xf32>
    %138 = arith.select %136, %132, %137 : vector<64x128xi1>, vector<64x128xf32>
    %139 = vector.extract_strided_slice %138 {offsets = [0, 0], sizes = [32, 128], strides = [1, 1]} : vector<64x128xf32> to vector<32x128xf32>
    %140 = arith.truncf %139 : vector<32x128xf32> to vector<32x128xbf16>
    %c0_86 = arith.constant 0 : index
    %c0_87 = arith.constant 0 : index
    %c0_88 = arith.constant 0 : index
    %141 = vector.load %arg14[%c0_86, %c0_87, %c0_88] : memref<1x32x128xbf16, #tpu.memory_space<vmem>>, vector<1x32x128xbf16>
    %142 = vector.shape_cast %141 : vector<1x32x128xbf16> to vector<32x128xbf16>
    %143 = vector.shape_cast %140 : vector<32x128xbf16> to vector<1x32x128xbf16>
    tpu.vector_store %arg14[%c0_86, %c0_87, %c0_88], %143 {strides = array<i32>} : memref<1x32x128xbf16, #tpu.memory_space<vmem>>, vector<1x32x128xbf16>,
    %144 = vector.extract_strided_slice %138 {offsets = [32, 0], sizes = [32, 128], strides = [1, 1]} : vector<64x128xf32> to vector<32x128xf32>
    %145 = arith.truncf %144 : vector<32x128xf32> to vector<32x128xbf16>
    %c0_89 = arith.constant 0 : index
    %c0_90 = arith.constant 0 : index
    %c0_91 = arith.constant 0 : index
    %146 = vector.load %arg15[%c0_89, %c0_90, %c0_91] : memref<1x32x128xbf16, #tpu.memory_space<vmem>>, vector<1x32x128xbf16>
    %147 = vector.shape_cast %146 : vector<1x32x128xbf16> to vector<32x128xbf16>
    %148 = vector.shape_cast %145 : vector<32x128xbf16> to vector<1x32x128xbf16>
    tpu.vector_store %arg15[%c0_89, %c0_90, %c0_91], %148 {strides = array<i32>} : memref<1x32x128xbf16, #tpu.memory_space<vmem>>, vector<1x32x128xbf16>,
    return
  }
  func.func @transform_0(%arg0: i32) -> (i32, i32, i32, i32) {
    %c0_i32 = arith.constant 0 : i32
    %c0_i32_0 = arith.constant 0 : i32
    %c0_i32_1 = arith.constant 0 : i32
    %c0_i32_2 = arith.constant 0 : i32
    return %arg0, %c0_i32, %c0_i32_0, %c0_i32_1 : i32, i32, i32, i32
  }
  func.func @transform_1(%arg0: i32) -> (i32, i32) {
    %c0_i32 = arith.constant 0 : i32
    %c0_i32_0 = arith.constant 0 : i32
    %c0_i32_1 = arith.constant 0 : i32
    return %c0_i32, %c0_i32_0 : i32, i32
  }
  func.func @transform_2(%arg0: i32) -> (i32, i32) {
    %c0_i32 = arith.constant 0 : i32
    %c0_i32_0 = arith.constant 0 : i32
    %c0_i32_1 = arith.constant 0 : i32
    return %c0_i32, %c0_i32_0 : i32, i32
  }
  func.func @transform_3(%arg0: i32) -> (i32, i32, i32) {
    %c0_i32 = arith.constant 0 : i32
    %c0_i32_0 = arith.constant 0 : i32
    %c0_i32_1 = arith.constant 0 : i32
    %c0_i32_2 = arith.constant 0 : i32
    return %c0_i32, %c0_i32_0, %c0_i32_1 : i32, i32, i32
  }
  func.func @transform_4(%arg0: i32) -> (i32, i32) {
    %c0_i32 = arith.constant 0 : i32
    %c0_i32_0 = arith.constant 0 : i32
    %c0_i32_1 = arith.constant 0 : i32
    return %c0_i32, %c0_i32_0 : i32, i32
  }
  func.func @transform_5(%arg0: i32) -> (i32, i32) {
    %c0_i32 = arith.constant 0 : i32
    %c0_i32_0 = arith.constant 0 : i32
    %c0_i32_1 = arith.constant 0 : i32
    return %c0_i32, %c0_i32_0 : i32, i32
  }
  func.func @transform_6(%arg0: i32) -> (i32, i32) {
    %c0_i32 = arith.constant 0 : i32
    %c0_i32_0 = arith.constant 0 : i32
    %c0_i32_1 = arith.constant 0 : i32
    return %c0_i32, %c0_i32_0 : i32, i32
  }
  func.func @transform_7(%arg0: i32) -> (i32, i32) {
    %c0_i32 = arith.constant 0 : i32
    %c0_i32_0 = arith.constant 0 : i32
    %c0_i32_1 = arith.constant 0 : i32
    return %c0_i32, %c0_i32_0 : i32, i32
  }
  func.func @transform_8(%arg0: i32) -> (i32, i32) {
    %c0_i32 = arith.constant 0 : i32
    %c0_i32_0 = arith.constant 0 : i32
    %c0_i32_1 = arith.constant 0 : i32
    return %c0_i32, %c0_i32_0 : i32, i32
  }
  func.func @transform_9(%arg0: i32) -> (i32, i32, i32) {
    %c0_i32 = arith.constant 0 : i32
    %c0_i32_0 = arith.constant 0 : i32
    %c0_i32_1 = arith.constant 0 : i32
    %c0_i32_2 = arith.constant 0 : i32
    return %c0_i32, %c0_i32_0, %c0_i32_1 : i32, i32, i32
  }
  func.func @transform_10(%arg0: i32) -> (i32, i32) {
    %c0_i32 = arith.constant 0 : i32
    %c0_i32_0 = arith.constant 0 : i32
    %c0_i32_1 = arith.constant 0 : i32
    return %c0_i32, %c0_i32_0 : i32, i32
  }
  func.func @transform_11(%arg0: i32) -> (i32, i32, i32, i32) {
    %c0_i32 = arith.constant 0 : i32
    %c0_i32_0 = arith.constant 0 : i32
    %c0_i32_1 = arith.constant 0 : i32
    %c0_i32_2 = arith.constant 0 : i32
    return %arg0, %c0_i32, %c0_i32_0, %c0_i32_1 : i32, i32, i32, i32
  }
  func.func @transform_12(%arg0: i32) -> (i32, i32, i32) {
    %c0_i32 = arith.constant 0 : i32
    %c0_i32_0 = arith.constant 0 : i32
    %c0_i32_1 = arith.constant 0 : i32
    return %arg0, %c0_i32, %c0_i32_0 : i32, i32, i32
  }
  func.func @transform_13(%arg0: i32) -> (i32, i32, i32) {
    %c0_i32 = arith.constant 0 : i32
    %c0_i32_0 = arith.constant 0 : i32
    %c0_i32_1 = arith.constant 0 : i32
    return %arg0, %c0_i32, %c0_i32_0 : i32, i32, i32
  }
  func.func @transform_14(%arg0: i32) -> (i32, i32, i32) {
    %c0_i32 = arith.constant 0 : i32
    %c0_i32_0 = arith.constant 0 : i32
    %c0_i32_1 = arith.constant 0 : i32
    return %arg0, %c0_i32, %c0_i32_0 : i32, i32, i32
  }
}

</mosaic_0001>

<bundles_post_ra>
// kernel: jcu_discriminator_forward.1
= control target key start
LH: loop header
LB: loop body
LE: loop exit
PB: predicated region body
PF: predicated region fallthrough
CT: control target
= control target key end

     0   :  { %s4258_s29 = smov 0   ;;  %s5890_s0 = inlined_call_operand.vmem [shape: bf16[2,2,128,128], index: 0, kind: input, shape index: {}]   ;;  %s5891_s1 = inlined_call_operand.vmem [shape: bf16[256,128], index: 1, kind: input, shape index: {}]   ;;  %s5892_s2 = inlined_call_operand.vmem [shape: f32[256,1], index: 2, kind: input, shape index: {}]   ;;  %s5893_s3 = inlined_call_operand.vmem [shape: bf16[3,64,256], index: 3, kind: input, shape index: {}]   ;;  %s5894_s4 = inlined_call_operand.vmem [shape: f32[64,1], index: 4, kind: input, shape index: {}]   ;;  %s5895_s5 = inlined_call_operand.vmem [shape: bf16[128,128], index: 5, kind: input, shape index: {}]   ;;  %s5896_s6 = inlined_call_operand.vmem [shape: bf16[128,128], index: 6, kind: input, shape index: {}]   ;;  %s5897_s7 = inlined_call_operand.vmem [shape: bf16[128,64], index: 7, kind: input, shape index: {}]   ;;  %s5898_s8 = inlined_call_operand.vmem [shape: f32[128,1], index: 8, kind: input, shape index: {}]   ;;  %s5899_s9 = inlined_call_operand.vmem [shape: bf16[3,64,128], index: 9, kind: input, shape index: {}]   ;;  %s5900_s10 = inlined_call_operand.vmem [shape: f32[64,1], index: 10, kind: input, shape index: {}]   ;;  %s5901_s11 = inlined_call_operand.vmem [shape: bf16[2,2,64,128], index: 11, kind: output, shape index: {0}]   ;;  %s5902_s12 = inlined_call_operand.vmem [shape: bf16[2,128,128], index: 12, kind: output, shape index: {1}]   ;;  %s5903_s13 = inlined_call_operand.vmem [shape: bf16[2,32,128], index: 13, kind: output, shape index: {2}]   ;;  %s5904_s14 = inlined_call_operand.vmem [shape: bf16[2,32,128], index: 14, kind: output, shape index: {3}]  }
   0x1 LB: > { %s3192_s30 = sadd.s32 4294967295, %s4178_s29   ;;  %p3196_p0 = scmp.ge.s32.totalorder %s4178_s29, 1  ;;  %s4178_s29 = sphi %s4258_s29, %s25_s29  }
   0x2   : > { %p419_p1 = scmp.lt.s32.totalorder %s4178_s29, 3 }
   0x4   : > { %p420_p2 = pnand %p3196_p0, %p419_p1 }
   0x6   : > { %423 = sbr.rel (%p420_p2) target bundleno = 1814 (0x716), region = 64 }
   0xb   : > { %v570_v0 = vld [vmem:[%s5892_s2 + $0xf0] sm:$0xff]  ;;  %p480_p3 = scmp.lt.s32.totalorder %s3192_s30, 1  ;;  %v4180_v2 = vmov 0   ;;  %v552_v3 = vld [vmem:[%s5892_s2 + $0x60] sm:$0xff]  ;;  %v571_v6 = vld [vmem:[%s5892_s2 + $0xf8] sm:$0xff]  ;;  %s4181_s28 = smov 127  }
   0xc   : > { %v554_v1 = vld [vmem:[%s5892_s2 + $0x70] sm:$0xff]  ;;  %4170 = vset.pattern.permute.xlu1 %v4180_v2  ;;  %4169 = vset.pattern.permute.xlu0 %v4180_v2  ;;  %v555_v7 = vld [vmem:[%s5892_s2 + $0x78] sm:$0xff]  ;;  %v553_v10 = vld [vmem:[%s5892_s2 + $0x68] sm:$0xff]  ;;  %s4182_s15 = smov 1  }
   0xd   : > { %740 = vperm.xlu1 %4170, %v570_v0   ;;  %660 = vperm.xlu0 %4169, %v554_v1   ;;  %s5921_s30 = smov (!%p480_p3, %s3192_s30), 1  ;;  %v569_v13 = vld [vmem:[%s5892_s2 + $0xe8] sm:$0xff]  ;;  %v568_v14 = vld [vmem:[%s5892_s2 + $0xe0] sm:$0xff]  ;;  %v550_v17 = vld [vmem:[%s5892_s2 + $0x50] sm:$0xff] }
   0xe   : > { %4171 = vset.pattern.permute.xlu2 %v4180_v2  ;;  %s3929_s21 = sshll.u32 %s5921_s30, 7  ;;  %v566_v20 = vld [vmem:[%s5892_s2 + $0xd0] sm:$0xff]  ;;  %v551_v21 = vld [vmem:[%s5892_s2 + $0x58] sm:$0xff]  ;;  %v549_v27 = vld [vmem:[%s5892_s2 + $0x48] sm:$0xff]  ;;  %s3930_s16 = sshll.u32 %s5921_s30, 6 }
   0xf   : > { %650 = vperm.xlu2 %4171, %v552_v3   ;;  %s4281_s24 = scalar_lea.vmem %s5890_s0, %s3929_s21  ;;  %v567_v24 = vld [vmem:[%s5892_s2 + $0xd8] sm:$0xff]  ;;  %v548_v28 = vld [vmem:[%s5892_s2 + $0x40] sm:$0xff]  ;;  %v546_v33 = vld [vmem:[%s5892_s2 + $0x30] sm:$0xff]  ;;  %s5365_s19 = scalar_lea.vmem %s5901_s11, %s3930_s16 }
  0x10   : > { %v3957_v4 = vld [vmem:[%s4281_s24 + $0x38] sm:$0xff]  ;;  %v3956_v8 = vld [vmem:[%s4281_s24 + $0x30] sm:$0xff]  ;;  %v3955_v11 = vld [vmem:[%s4281_s24 + $0x28] sm:$0xff] }
  0x11   : > { %v3965_v5 = vld [vmem:[%s4281_s24 + $0x78] sm:$0xff]  ;;  %892 = vmatpush.bf16.msra.mxu0 %v3957_v4  ;;  %v3964_v9 = vld [vmem:[%s4281_s24 + $0x70] sm:$0xff]  ;;  %v3963_v12 = vld [vmem:[%s4281_s24 + $0x68] sm:$0xff] }
  0x12   : > { %1097 = vmatpush.bf16.msra.mxu1 %v3965_v5  ;;  %v3954_v15 = vld [vmem:[%s4281_s24 + $0x20] sm:$0xff]  ;;  %v3953_v18 = vld [vmem:[%s4281_s24 + $0x18] sm:$0xff]  ;;  %v3952_v22 = vld [vmem:[%s4281_s24 + $0x10] sm:$0xff] }
  0x13   : > { %v3962_v16 = vld [vmem:[%s4281_s24 + $0x60] sm:$0xff]  ;;  %v3961_v19 = vld [vmem:[%s4281_s24 + $0x58] sm:$0xff]  ;;  %v3960_v23 = vld [vmem:[%s4281_s24 + $0x50] sm:$0xff] }
  0x14   : > { %v3951_v25 = vld [vmem:[%s4281_s24 + $0x8] sm:$0xff]  ;;  %v3950_v29 = vld [vmem:[%s4281_s24] sm:$0xff]  ;;  %v547_v35 = vld [vmem:[%s5892_s2 + $0x38] sm:$0xff] }
  0x15   : > { %745 = vperm.xlu1 %4170, %v571_v6   ;;  %665 = vperm.xlu0 %4169, %v555_v7   ;;  %v3959_v26 = vld [vmem:[%s4281_s24 + $0x48] sm:$0xff]  ;;  %v3958_v30 = vld [vmem:[%s4281_s24 + $0x40] sm:$0xff]  ;;  %v563_v36 = vld [vmem:[%s5892_s2 + $0xb8] sm:$0xff]  ;;  %s5700_s24 = scalar_lea.vmem %s5902_s12, %s3930_s16 }
  0x16   : > { %893 = vmatpush.bf16.msra.mxu0 %v3956_v8  ;;  %1098 = vmatpush.bf16.msra.mxu1 %v3964_v9  ;;  %v564_v31 = vld [vmem:[%s5892_s2 + $0xc0] sm:$0xff]  ;;  %v565_v34 = vld [vmem:[%s5892_s2 + $0xc8] sm:$0xff]  ;;  %v562_v37 = vld [vmem:[%s5892_s2 + $0xb0] sm:$0xff] }
  0x17   : > { %655 = vperm.xlu2 %4171, %v553_v10   ;;  %v3934_v32 = vld [vmem:[%s5891_s1] sm:$0xff]  ;;  %v3935_v39 = vld [vmem:[%s5891_s1 + $0x8] sm:$0xff]  ;;  %v543_v43 = vld [vmem:[%s5892_s2 + $0x18] sm:$0xff] }
  0x18   : > { %v544_v38 = vld [vmem:[%s5892_s2 + $0x20] sm:$0xff]  ;;  %v545_v41 = vld [vmem:[%s5892_s2 + $0x28] sm:$0xff]  ;;  %v542_v44 = vld [vmem:[%s5892_s2 + $0x10] sm:$0xff] }
  0x19   : > { %v560_v40 = vld [vmem:[%s5892_s2 + $0xa0] sm:$0xff]  ;;  %v561_v42 = vld [vmem:[%s5892_s2 + $0xa8] sm:$0xff]  ;;  %v558_v45 = vld [vmem:[%s5892_s2 + $0x90] sm:$0xff] }
  0x1a   : > { %894 = vmatpush.bf16.msra.mxu0 %v3955_v11  ;;  %1099 = vmatpush.bf16.msra.mxu1 %v3963_v12  ;;  %v3936_v46 = vld [vmem:[%s5891_s1 + $0x10] sm:$0xff]  ;;  %v540_v47 = vld [vmem:[%s5892_s2] sm:$0xff]  ;;  %v541_v48 = vld [vmem:[%s5892_s2 + $0x8] sm:$0xff] }
  0x1b   : > { %v3937_v49 = vld [vmem:[%s5891_s1 + $0x18] sm:$0xff]  ;;  %v3938_v51 = vld [vmem:[%s5891_s1 + $0x20] sm:$0xff]  ;;  %v3939_v54 = vld [vmem:[%s5891_s1 + $0x28] sm:$0xff] }
  0x1c   : > { %v3940_v60 = vld [vmem:[%s5891_s1 + $0x30] sm:$0xff]  ;;  %v559_v63 = vld [vmem:[%s5892_s2 + $0x98] sm:$0xff]  ;;  %v556_v3 = vld [vmem:[%s5892_s2 + $0x80] sm:$0xff] }
  0x1d   : > { %735 = vperm.xlu1 %4170, %v569_v13   ;;  %730 = vperm.xlu0 %4169, %v568_v14   ;;  %v3941_v5 = vld [vmem:[%s5891_s1 + $0x38] sm:$0xff]  ;;  %v557_v8 = vld [vmem:[%s5892_s2 + $0x88] sm:$0xff]  ;;  %v3942_v12 = vld [vmem:[%s5891_s1 + $0x40] sm:$0xff] }
  0x1e   : > { %895 = vmatpush.bf16.msra.mxu0 %v3954_v15  ;;  %1100 = vmatpush.bf16.msra.mxu1 %v3962_v16 }
  0x1f   : > { %640 = vperm.xlu2 %4171, %v550_v17  }
  0x22   : > { %896 = vmatpush.bf16.msra.mxu0 %v3953_v18  ;;  %1101 = vmatpush.bf16.msra.mxu1 %v3961_v19 }
  0x25   : > { %720 = vperm.xlu1 %4170, %v566_v20   ;;  %645 = vperm.xlu0 %4169, %v551_v21  }
  0x26   : > { %897 = vmatpush.bf16.msra.mxu0 %v3952_v22  ;;  %1102 = vmatpush.bf16.msra.mxu1 %v3960_v23  ;;  %v3943_v23 = vld [vmem:[%s5891_s1 + $0x48] sm:$0xff] }
  0x27   : > { %725 = vperm.xlu2 %4171, %v567_v24  }
  0x2a   : > { %898 = vmatpush.bf16.msra.mxu0 %v3951_v25  ;;  %1103 = vmatpush.bf16.msra.mxu1 %v3959_v26 }
  0x2d   : > { %635 = vperm.xlu1 %4170, %v549_v27   ;;  %630 = vperm.xlu0 %4169, %v548_v28  }
  0x2e   : > { %899 = vmatpush.bf16.msra.mxu0 %v3950_v29  ;;  %1104 = vmatpush.bf16.msra.mxu1 %v3958_v30 }
  0x2f   : > { %710 = vperm.xlu2 %4171, %v564_v31  }
  0x31   : > { %900 = vmatmul.bf16.vlgmr.msra.gmra.mxu0 %v3934_v32  ;;  %1105 = vmatmul.bf16.vlgmr.msra.gmra.mxu1 %v3934_v32 }
  0x35   : > { %620 = vperm.xlu1 %4170, %v546_v33   ;;  %715 = vperm.xlu0 %4169, %v565_v34  }
  0x37   : > { %625 = vperm.xlu2 %4171, %v547_v35  }
  0x3d   : > { %705 = vperm.xlu1 %4170, %v563_v36   ;;  %700 = vperm.xlu0 %4169, %v562_v37  }
  0x3f   : > { %610 = vperm.xlu2 %4171, %v544_v38  }
  0x41   : > { %905 = vmatmul.bf16.gmra.mxu0 %v3935_v39  ;;  %1110 = vmatmul.bf16.gmra.mxu1 %v3935_v39 }
  0x45   : > { %690 = vperm.xlu1 %4170, %v560_v40   ;;  %615 = vperm.xlu0 %4169, %v545_v41  }
  0x47   : > { %695 = vperm.xlu2 %4171, %v561_v42  }
  0x4d   : > { %605 = vperm.xlu1 %4170, %v543_v43   ;;  %600 = vperm.xlu0 %4169, %v542_v44   ;;  %v3944_v44 = vld [vmem:[%s5891_s1 + $0x50] sm:$0xff] }
  0x4f   : > { %680 = vperm.xlu2 %4171, %v558_v45  }
  0x51   : > { %910 = vmatmul.bf16.gmra.mxu0 %v3936_v46  ;;  %1115 = vmatmul.bf16.gmra.mxu1 %v3936_v46 }
  0x55   : > { %590 = vperm.xlu1 %4170, %v540_v47   ;;  %685 = vperm.xlu0 %4169, %v559_v63   ;;  %v1265_v63 = vld [vmem:[%s5894_s4 + $0x28] sm:$0xff] }
  0x57   : > { %595 = vperm.xlu2 %4171, %v541_v48  }
  0x5d   : > { %670 = vperm.xlu0 %4169, %v556_v3   ;;  %675 = vperm.xlu1 %4170, %v557_v8   ;;  %v1266_v3 = vld [vmem:[%s5894_s4 + $0x30] sm:$0xff] }
  0x61   : > { %915 = vmatmul.bf16.gmra.mxu0 %v3937_v49  ;;  %1120 = vmatmul.bf16.gmra.mxu1 %v3937_v49 }
  0x65   : > { %1621 = vperm.xlu0 %4169, %v1265_v63   ;;  %1626 = vperm.xlu1 %4170, %v1266_v3  }
  0x69   : > { %v4389_v50 = vpop.permute.xlu2 %650 }
  0x71   : > { %920 = vmatmul.bf16.gmra.mxu0 %v3938_v51  ;;  %1125 = vmatmul.bf16.gmra.mxu1 %v3938_v51  ;;  %v4394_v52 = vpop.permute.xlu2 %655 }
  0x79   : > { %v4396_v53 = vpop.permute.xlu2 %640 }
  0x7f   : > { %v4401_v55 = vpop.permute.xlu1 %740  ;;  %v4403_v56 = vpop.permute.xlu0 %660 }
  0x81   : > { %925 = vmatmul.bf16.gmra.mxu0 %v3939_v54  ;;  %1130 = vmatmul.bf16.gmra.mxu1 %v3939_v54  ;;  %v4409_v59 = vpop.permute.xlu2 %725 }
  0x87   : > { %v4405_v57 = vpop.permute.xlu1 %745  ;;  %v4407_v58 = vpop.permute.xlu0 %665 }
  0x89   : > { %v4421_v0 = vpop.permute.xlu2 %710 }
  0x8f   : > { %v4414_v61 = vpop.permute.xlu1 %735  ;;  %v4416_v62 = vpop.permute.xlu0 %730 }
  0x91   : > { %930 = vmatmul.bf16.gmra.mxu0 %v3940_v60  ;;  %1135 = vmatmul.bf16.gmra.mxu1 %v3940_v60  ;;  %v4430_v4 = vpop.permute.xlu2 %625 }
  0x97   : > { %v4423_v1 = vpop.permute.xlu1 %720  ;;  %v4425_v2 = vpop.permute.xlu0 %645 }
  0x99   : > { %v611_v9 = vpop.permute.xlu2 %610 }
  0x9f   : > { %v4435_v6 = vpop.permute.xlu1 %635  ;;  %v4437_v7 = vpop.permute.xlu0 %630 }
  0xa1   : > { %935 = vmatmul.bf16.gmra.mxu0 %v3941_v5  ;;  %1140 = vmatmul.bf16.gmra.mxu1 %v3941_v5  ;;  %v4451_v16 = vpop.permute.xlu2 %695 }
  0xa7   : > { %v4442_v10 = vpop.permute.xlu1 %620  ;;  %v4444_v11 = vpop.permute.xlu0 %715 }
  0xa9   : > { %v4457_v21 = vpop.permute.xlu2 %680 }
  0xae   : > { %v901_v14 = vpop.f32.mrf.mxu0  ;;  %v1106_v15 = vpop.f32.mrf.mxu1 }
  0xaf   : > { %v4449_v13 = vpop.permute.xlu1 %705  ;;  %v4453_v17 = vpop.permute.xlu0 %700 }
  0xb1   : > { %940 = vmatmul.bf16.gmra.mxu0 %v3942_v12  ;;  %1145 = vmatmul.bf16.gmra.mxu1 %v3942_v12  ;;  %v596_v27 = vpop.permute.xlu2 %595 }
  0xb6   : > { %v903_v19 = vpop.f32.mrf.mxu0  ;;  %v1108_v20 = vpop.f32.mrf.mxu1 }
  0xb7   : > { %v4455_v18 = vpop.permute.xlu1 %690  ;;  %v616_v22 = vpop.permute.xlu0 %615  ;;  %v904_v28 = vadd.f32 %v903_v19, %v596_v27  ;;  %v1109_v32 = vadd.f32 %v1108_v20, %v596_v27  ;;  %v1263_v19 = vld [vmem:[%s5894_s4 + $0x18] sm:$0xff] }
  0xb8   : > { %1611 = vperm.xlu1 %4170, %v1263_v19  }
  0xbe   : > { %v906_v25 = vpop.f32.mrf.mxu0  ;;  %v1111_v26 = vpop.f32.mrf.mxu1 }
  0xbf   : > { %v606_v24 = vpop.permute.xlu1 %605  ;;  %v601_v29 = vpop.permute.xlu0 %600 }
  0xc0   : > { %v907_v30 = vadd.f32 %v906_v25, %v601_v29  ;;  %v1112_v37 = vadd.f32 %v1111_v26, %v601_v29  ;;  %v3946_v29 = vld [vmem:[%s5891_s1 + $0x60] sm:$0xff] }
  0xc1   : > { %945 = vmatmul.bf16.gmra.mxu0 %v3943_v23  ;;  %1150 = vmatmul.bf16.gmra.mxu1 %v3943_v23 }
  0xc6   : > { %v908_v35 = vpop.f32.mrf.mxu0  ;;  %v1113_v36 = vpop.f32.mrf.mxu1 }
  0xc7   : > { %v591_v31 = vpop.permute.xlu1 %590  ;;  %v909_v38 = vadd.f32 %v908_v35, %v606_v24  ;;  %v1114_v39 = vadd.f32 %v1113_v36, %v606_v24  ;;  %v1264_v36 = vld [vmem:[%s5894_s4 + $0x20] sm:$0xff] }
  0xc8   : > { %v902_v33 = vadd.f32 %v901_v14, %v591_v31  ;;  %v1107_v34 = vadd.f32 %v1106_v15, %v591_v31  ;;  %v1262_v15 = vld [vmem:[%s5894_s4 + $0x10] sm:$0xff] }
  0xc9   : > { %v4466_v42 = vpack.c.bf16 %v909_v38, %v907_v30  ;;  %v4468_v43 = vpack.c.bf16 %v1114_v39, %v1112_v37  ;;  %1606 = vperm.xlu0 %4169, %v1262_v15   ;;  %v3948_v39 = vld [vmem:[%s5891_s1 + $0x70] sm:$0xff] }
  0xca   : > { %v4462_v40 = vpack.c.bf16 %v1109_v32, %v1107_v34  ;;  %v4464_v41 = vpack.c.bf16 %v904_v28, %v902_v33 }
  0xcc   : > { %5910 = vst [vmem:[#allocation2_spill] sm:$0xff] %v4464_v41 }
  0xce   : > { %v911_v45 = vpop.f32.mrf.mxu0  ;;  %v1116_v46 = vpop.f32.mrf.mxu1 }
  0xcf   : > { %v912_v47 = vadd.f32 %v911_v45, %v611_v9  ;;  %v1117_v51 = vadd.f32 %v1116_v46, %v611_v9  ;;  %v3945_v9 = vld [vmem:[%s5891_s1 + $0x58] sm:$0xff] }
  0xd1   : > { %950 = vmatmul.bf16.gmra.mxu0 %v3944_v44  ;;  %1155 = vmatmul.bf16.gmra.mxu1 %v3944_v44 }
  0xd6   : > { %v913_v48 = vpop.f32.mrf.mxu0  ;;  %v1118_v49 = vpop.f32.mrf.mxu1 }
  0xd7   : > { %v914_v54 = vadd.f32 %v913_v48, %v616_v22  ;;  %v1119_v60 = vadd.f32 %v1118_v49, %v616_v22  ;;  %v3949_v48 = vld [vmem:[%s5891_s1 + $0x78] sm:$0xff]  ;;  %v506_v49 = vlaneseq }
  0xd9   : > { %v4479_v5 = vpack.c.bf16 %v914_v54, %v912_v47  ;;  %v4481_v8 = vpack.c.bf16 %v1119_v60, %v1117_v51  ;;  %v4520_v60 = vand.u32 127, %v506_v49  ;;  %v3971_v49 = vld [vmem:[%s5893_s3 + $0x24] sm:$0xf0] }
  0xdb   : > { %5911 = vst [vmem:[#allocation3_spill] sm:$0xff] %v4520_v60  ;;  %vm981_vm0 = vcmp.lt.s32.totalorder %v4520_v60, 8 }
  0xdc   : > { %vm4532_vm1 = vmpackc.low %vm981_vm0, %vm981_vm0 }
  0xde   : > { %v916_v12 = vpop.f32.mrf.mxu0  ;;  %v1121_v14 = vpop.f32.mrf.mxu1 }
  0xdf   : > { %v917_v20 = vadd.f32 %v916_v12, %v4442_v10  ;;  %v1122_v24 = vadd.f32 %v1121_v14, %v4442_v10  ;;  %v1267_v10 = vld [vmem:[%s5894_s4 + $0x38] sm:$0xff] }
  0xe0   : > { %1631 = vperm.xlu2 %4171, %v1267_v10  }
  0xe1   : > { %955 = vmatmul.bf16.gmra.mxu0 %v3945_v9  ;;  %1160 = vmatmul.bf16.gmra.mxu1 %v3945_v9 }
  0xe6   : > { %v918_v22 = vpop.f32.mrf.mxu0  ;;  %v1123_v23 = vpop.f32.mrf.mxu1 }
  0xe7   : > { %v919_v25 = vadd.f32 %v918_v22, %v4430_v4  ;;  %v1124_v26 = vadd.f32 %v1123_v23, %v4430_v4  ;;  %v3947_v4 = vld [vmem:[%s5891_s1 + $0x68] sm:$0xff] }
  0xe8   : > { %1616 = vperm.xlu2 %4171, %v1264_v36  }
  0xe9   : > { %v4496_v27 = vpack.c.bf16 %v919_v25, %v917_v20  ;;  %v4498_v28 = vpack.c.bf16 %v1124_v26, %v1122_v24 }
  0xee   : > { %v921_v30 = vpop.f32.mrf.mxu0  ;;  %v4503_v31 = vpop.f32.mrf.mxu1 }
  0xf1   : > { %960 = vmatmul.bf16.gmra.mxu0 %v3946_v29  ;;  %1165 = vmatmul.bf16.gmra.mxu1 %v3946_v29 }
  0xf6   : > { %v923_v32 = vpop.f32.mrf.mxu0  ;;  %v1128_v33 = vpop.f32.mrf.mxu1 }
  0xfe   : > { %v926_v34 = vpop.f32.mrf.mxu0  ;;  %v1131_v35 = vpop.f32.mrf.mxu1 }
  0xff   : > { %v927_v26 = vadd.f32 %v926_v34, %v4396_v53  ;;  %v1132_v34 = vadd.f32 %v1131_v35, %v4396_v53  ;;  %v1129_v53 = vadd.f32 %v1128_v33, %v4435_v6 }
 0x101   : > { %965 = vmatmul.bf16.gmra.mxu0 %v3947_v4  ;;  %1170 = vmatmul.bf16.gmra.mxu1 %v3947_v4 }
 0x106   : > { %v928_v37 = vpop.f32.mrf.mxu0  ;;  %v1133_v38 = vpop.f32.mrf.mxu1 }
 0x10e   : > { %v931_v44 = vpop.f32.mrf.mxu0  ;;  %v1136_v45 = vpop.f32.mrf.mxu1 }
 0x10f   : > { %v932_v3 = vadd.f32 %v931_v44, %v4389_v50  ;;  %v1137_v29 = vadd.f32 %v1136_v45, %v4389_v50  ;;  %v3967_v44 = vld [vmem:[%s5893_s3 + $0x4] sm:$0xf0] }
 0x111   : > { %970 = vmatmul.bf16.gmra.mxu0 %v3948_v39  ;;  %1175 = vmatmul.bf16.gmra.mxu1 %v3948_v39  ;;  %v3369_v39 = vld [vmem:[%s5893_s3] sm:$0xf] }
 0x116   : > { %v933_v46 = vpop.f32.mrf.mxu0  ;;  %v1138_v47 = vpop.f32.mrf.mxu1 }
 0x117   : > { %v934_v14 = vadd.f32 %v933_v46, %v4394_v52  ;;  %v1139_v23 = vadd.f32 %v1138_v47, %v4394_v52  ;;  %v1134_v52 = vadd.f32 %v1133_v38, %v4425_v2  ;;  %v1127_v38 = vadd.f32 %v4503_v31, %v4437_v7 }
 0x118   : > { %v3370_v47 = vor.u32 %v3967_v44, %v3369_v39  ;;  %v3449_v44 = vld [vmem:[%s5893_s3 + $0x40] sm:$0xf] }
 0x119   : > { %v4556_v10 = vpack.c.bf16 %v1139_v23, %v1137_v29  ;;  %v4577_v35 = vpack.c.bf16 %v1134_v52, %v1132_v34 }
 0x11e   : > { %v936_v51 = vpop.f32.mrf.mxu0  ;;  %v1141_v54 = vpop.f32.mrf.mxu1 }
 0x11f   : > { %v937_v63 = vadd.f32 %v936_v51, %v4403_v56  ;;  %v1142_v15 = vadd.f32 %v1141_v54, %v4403_v56  ;;  %v929_v56 = vadd.f32 %v928_v37, %v4425_v2  ;;  %v922_v2 = vadd.f32 %v921_v30, %v4437_v7 }
 0x120   : > { %v924_v37 = vadd.f32 %v923_v32, %v4435_v6  ;;  %v4592_v6 = vpack.c.bf16 %v1129_v53, %v1127_v38 }
 0x121   : > { %975 = vmatmul.bf16.gmra.mxu0 %v3949_v48  ;;  %1180 = vmatmul.bf16.gmra.mxu1 %v3949_v48  ;;  %v4563_v36 = vpack.c.bf16 %v929_v56, %v927_v26  ;;  %v3385_v48 = vld [vmem:[%s5893_s3 + $0x20] sm:$0xf] }
 0x122   : > { %v4590_v30 = vpack.c.bf16 %v924_v37, %v922_v2  ;;  %v3386_v51 = vor.u32 %v3971_v49, %v3385_v48 }
 0x126   : > { %v938_v9 = vpop.f32.mrf.mxu0  ;;  %v1143_v12 = vpop.f32.mrf.mxu1 }
 0x127   : > { %v939_v19 = vadd.f32 %v938_v9, %v4407_v58  ;;  %v1144_v20 = vadd.f32 %v1143_v12, %v4407_v58  ;;  %v4544_v58 = vpack.c.bf16 %v934_v14, %v932_v3  ;;  %v3377_v3 = vld [vmem:[%s5893_s3 + $0x10] sm:$0xf]  ;;  %v3969_v9 = vld [vmem:[%s5893_s3 + $0x14] sm:$0xf0] }
 0x129   : > { %v4537_v24 = vpack.c.bf16 %v939_v19, %v937_v63  ;;  %v4539_v25 = vpack.c.bf16 %v1144_v20, %v1142_v15  ;;  %v3378_v15 = vor.u32 %v3969_v9, %v3377_v3  ;;  %v3393_v19 = vld [vmem:[%s5893_s3 + $0x30] sm:$0xf]  ;;  %v3973_v20 = vld [vmem:[%s5893_s3 + $0x34] sm:$0xf0] }
 0x12a   : > { %v3394_v23 = vor.u32 %v3973_v20, %v3393_v19  ;;  %v3977_v19 = vld [vmem:[%s5893_s3 + $0x54] sm:$0xf0] }
 0x12b   : > { %3401 = vmatpush.bf16.msk.msra.mxu2 %vm4532_vm1, %v4539_v25  ;;  %3657 = vmatpush.bf16.msk.msrb.mxu0 %vm4532_vm1, %v4537_v24 }
 0x12c   : > { %4142 = vmatpush.bf16.msk.msrb.mxu1 %vm4532_vm1, %v4537_v24 }
 0x12e   : > { %v4558_v4 = vpop.f32.mrf.mxu0  ;;  %v4560_v50 = vpop.f32.mrf.mxu1 }
 0x12f   : > { %3404 = vmatpush.bf16.msk.msra.mxu2 %vm4532_vm1, %v4556_v10  ;;  %3660 = vmatpush.bf16.msk.msrb.mxu0 %vm4532_vm1, %v4544_v58 }
 0x130   : > { %4143 = vmatpush.bf16.msk.msrb.mxu1 %vm4532_vm1, %v4544_v58 }
 0x133   : > { %3407 = vmatpush.bf16.msk.msra.mxu2 %vm4532_vm1, %v4577_v35  ;;  %3663 = vmatpush.bf16.msk.msrb.mxu0 %vm4532_vm1, %v4563_v36 }
 0x134   : > { %4144 = vmatpush.bf16.msk.msrb.mxu1 %vm4532_vm1, %v4563_v36 }
 0x136   : > { %v4594_v32 = vpop.f32.mrf.mxu0  ;;  %v4596_v33 = vpop.f32.mrf.mxu1 }
 0x137   : > { %3410 = vmatpush.bf16.msk.msra.mxu2 %vm4532_vm1, %v4592_v6  ;;  %3666 = vmatpush.bf16.msk.msrb.mxu0 %vm4532_vm1, %v4590_v30 }
 0x138   : > { %4145 = vmatpush.bf16.msk.msrb.mxu1 %vm4532_vm1, %v4590_v30 }
 0x13b   : > { %3413 = vmatpush.bf16.msk.msra.mxu2 %vm4532_vm1, %v4498_v28  ;;  %3669 = vmatpush.bf16.msk.msrb.mxu0 %vm4532_vm1, %v4496_v27 }
 0x13c   : > { %4146 = vmatpush.bf16.msk.msrb.mxu1 %vm4532_vm1, %v4496_v27 }
 0x13e   : > { %v4616_v7 = vpop.f32.mrf.mxu0  ;;  %v4618_v31 = vpop.f32.mrf.mxu1 }
 0x13f   : > { %3416 = vmatpush.bf16.msk.msra.mxu2 %vm4532_vm1, %v4481_v8  ;;  %3672 = vmatpush.bf16.msk.msrb.mxu0 %vm4532_vm1, %v4479_v5 }
 0x140   : > { %4147 = vmatpush.bf16.msk.msrb.mxu1 %vm4532_vm1, %v4479_v5 }
 0x143   : > { %3419 = vmatpush.bf16.msk.msra.mxu2 %vm4532_vm1, %v4468_v43  ;;  %3675 = vmatpush.bf16.msk.msrb.mxu0 %vm4532_vm1, %v4466_v42 }
 0x144   : > { %4148 = vmatpush.bf16.msk.msrb.mxu1 %vm4532_vm1, %v4466_v42 }
 0x146   : > { %v4644_v45 = vpop.f32.mrf.mxu0  ;;  %v4646_v46 = vpop.f32.mrf.mxu1 }
 0x147   : > { %3422 = vmatpush.bf16.msk.msra.mxu2 %vm4532_vm1, %v4462_v40  ;;  %3678 = vmatpush.bf16.msk.msrb.mxu0 %vm4532_vm1, %v4464_v41 }
 0x148   : > { %4149 = vmatpush.bf16.msk.msrb.mxu1 %vm4532_vm1, %v4464_v41 }
 0x14a   : > { %1316 = vmatmul.bf16.vlgmr.msra.gmra.mxu2 %v3370_v47  ;;  %1708 = vmatmul.bf16.vlgmr.msrb.gmra.mxu0 %v3370_v47  ;;  %v3975_v47 = vld [vmem:[%s5893_s3 + $0x44] sm:$0xf0] }
 0x14b   : > { %3481 = vmatpush.bf16.msk.msrb.mxu2 %vm4532_vm1, %v4537_v24  ;;  %1718 = vmatmul.bf16.vlgmr.msrb.gmra.mxu1 %v3386_v51 }
 0x14e   : > { %v4669_v54 = vpop.f32.mrf.mxu0  ;;  %v4671_v63 = vpop.f32.mrf.mxu1 }
 0x14f   : > { %3484 = vmatpush.bf16.msk.msrb.mxu2 %vm4532_vm1, %v4544_v58 }
 0x153   : > { %3487 = vmatpush.bf16.msk.msrb.mxu2 %vm4532_vm1, %v4563_v36 }
 0x156   : > { %v4685_v12 = vpop.f32.mrf.mxu0  ;;  %v4687_v14 = vpop.f32.mrf.mxu1 }
 0x157   : > { %3490 = vmatpush.bf16.msk.msrb.mxu2 %vm4532_vm1, %v4590_v30 }
 0x15a   : > { %1321 = vmatmul.bf16.gmra.mxu2 %v3378_v15  ;;  %1713 = vmatmul.bf16.gmra.mxu0 %v3378_v15  ;;  %v3457_v15 = vld [vmem:[%s5893_s3 + $0x50] sm:$0xf] }
 0x15b   : > { %3493 = vmatpush.bf16.msk.msrb.mxu2 %vm4532_vm1, %v4496_v27  ;;  %1723 = vmatmul.bf16.gmra.mxu1 %v3394_v23 }
 0x15e   : > { %v4701_v26 = vpop.f32.mrf.mxu0  ;;  %v4703_v56 = vpop.f32.mrf.mxu1 }
 0x15f   : > { %3496 = vmatpush.bf16.msk.msrb.mxu2 %vm4532_vm1, %v4479_v5 }
 0x163   : > { %3499 = vmatpush.bf16.msk.msrb.mxu2 %vm4532_vm1, %v4466_v42 }
 0x166   : > { %v4714_v29 = vpop.f32.mrf.mxu0  ;;  %v4716_v52 = vpop.f32.mrf.mxu1 }
 0x167   : > { %3502 = vmatpush.bf16.msk.msrb.mxu2 %vm4532_vm1, %v4464_v41 }
 0x16a   : > { %1326 = vmatmul.bf16.gmra.mxu2 %v3386_v51  ;;  %v4747_v51 = vor.u32 %v3975_v47, %v3449_v44  ;;  %v3979_v44 = vld [vmem:[%s5893_s3 + $0x64] sm:$0xf0] }
 0x16b   : > { %3561 = vmatpush.bf16.msk.msra.mxu2 %vm4532_vm1, %v4539_v25 }
 0x16c   : > { %5914 = vst [vmem:[#allocation4_spill] sm:$0xff] %v4747_v51 }
 0x16e   : > { %v961_v34 = vpop.f32.mrf.mxu0  ;;  %v4724_v2 = vpop.f32.mrf.mxu1 }
 0x16f   : > { %3564 = vmatpush.bf16.msk.msra.mxu2 %vm4532_vm1, %v4556_v10 }
 0x173   : > { %3567 = vmatpush.bf16.msk.msra.mxu2 %vm4532_vm1, %v4577_v35 }
 0x176   : > { %v963_v37 = vpop.f32.mrf.mxu0  ;;  %v1168_v53 = vpop.f32.mrf.mxu1 }
 0x177   : > { %3570 = vmatpush.bf16.msk.msra.mxu2 %vm4532_vm1, %v4592_v6 }
 0x17a   : > { %1331 = vmatmul.bf16.gmra.mxu2 %v3394_v23  ;;  %v4765_v23 = vor.u32 %v3977_v19, %v3457_v15 }
 0x17b   : > { %3573 = vmatpush.bf16.msk.msra.mxu2 %vm4532_vm1, %v4498_v28 }
 0x17c   : > { %5915 = vst [vmem:[#allocation5_spill] sm:$0xff] %v4765_v23 }
 0x17e   : > { %v966_v38 = vpop.f32.mrf.mxu0  ;;  %v1171_v39 = vpop.f32.mrf.mxu1 }
 0x17f   : > { %3576 = vmatpush.bf16.msk.msra.mxu2 %vm4532_vm1, %v4481_v8 }
 0x183   : > { %3579 = vmatpush.bf16.msk.msra.mxu2 %vm4532_vm1, %v4468_v43 }
 0x186   : > { %v968_v48 = vpop.f32.mrf.mxu0  ;;  %v1173_v49 = vpop.f32.mrf.mxu1 }
 0x187   : > { %3582 = vmatpush.bf16.msk.msra.mxu2 %vm4532_vm1, %v4462_v40 }
 0x18a   : > { %1430 = vmatmul.bf16.vlgmr.msrb.gmra.mxu2 %v4747_v51 }
 0x18b   : > { %3609 = vmatpush.bf16.msk.msrb.mxu2 %vm4532_vm1, %v4539_v25 }
 0x18e   : > { %v971_v3 = vpop.f32.mrf.mxu0  ;;  %v1176_v9 = vpop.f32.mrf.mxu1 }
 0x18f   : > { %3612 = vmatpush.bf16.msk.msrb.mxu2 %vm4532_vm1, %v4556_v10 }
 0x193   : > { %3615 = vmatpush.bf16.msk.msrb.mxu2 %vm4532_vm1, %v4577_v35 }
 0x196   : > { %v973_v20 = vpop.f32.mrf.mxu0  ;;  %v1178_v25 = vpop.f32.mrf.mxu1 }
 0x197   : > { %3618 = vmatpush.bf16.msk.msrb.mxu2 %vm4532_vm1, %v4592_v6  ;;  %v3465_v6 = vld [vmem:[%s5893_s3 + $0x60] sm:$0xf]  ;;  %v1179_v51 = vadd.f32 %v1178_v25, %v4414_v61  ;;  %v1162_v25 = vadd.f32 %v4703_v56, %v4453_v17  ;;  %v1157_v56 = vadd.f32 %v4671_v63, %v4455_v18 }
 0x198   : > { %v4786_v15 = vor.u32 %v3979_v44, %v3465_v6 }
 0x19a   : > { %1435 = vmatmul.bf16.gmra.mxu2 %v4765_v23  ;;  %v974_v23 = vadd.f32 %v973_v20, %v4414_v61  ;;  %v1174_v61 = vadd.f32 %v1173_v49, %v4409_v59  ;;  %v1169_v49 = vadd.f32 %v1168_v53, %v4444_v11  ;;  %v1164_v53 = vadd.f32 %v4716_v52, %v4449_v13 }
 0x19b   : > { %3621 = vmatpush.bf16.msk.msrb.mxu2 %vm4532_vm1, %v4498_v28 }
 0x19e   : > { %v976_v10 = vpop.f32.mrf.mxu0  ;;  %v1181_v35 = vpop.f32.mrf.mxu1 }
 0x19f   : > { %3624 = vmatpush.bf16.msk.msrb.mxu2 %vm4532_vm1, %v4481_v8  ;;  %v977_v19 = vadd.f32 %v976_v10, %v4401_v55  ;;  %v1182_v8 = vadd.f32 %v1181_v35, %v4401_v55  ;;  %v972_v55 = vadd.f32 %v971_v3, %v4416_v62  ;;  %v1177_v10 = vadd.f32 %v1176_v9, %v4416_v62 }
 0x1a0   : > { %v967_v3 = vadd.f32 %v966_v38, %v4423_v1  ;;  %v1172_v62 = vadd.f32 %v1171_v39, %v4423_v1  ;;  %v1167_v1 = vadd.f32 %v4724_v2, %v4421_v0  ;;  %v959_v2 = vadd.f32 %v4714_v29, %v4449_v13 }
 0x1a1   : > { %v952_v13 = vadd.f32 %v4669_v54, %v4455_v18  ;;  %v1159_v29 = vadd.f32 %v4687_v14, %v4451_v16  ;;  %v676_v18 = vpop.permute.xlu1 %675  ;;  %v1152_v35 = vadd.f32 %v4618_v31, %v4457_v21 }
 0x1a2   : > { %v4829_v9 = vpack.c.bf16 %v1174_v61, %v1172_v62  ;;  %v4853_v39 = vpack.c.bf16 %v1169_v49, %v1167_v1  ;;  %v3451_v61 = vld [vmem:[%s5893_s3 + $0x48] sm:$0xf0]  ;;  %v3976_v62 = vld [vmem:[%s5893_s3 + $0x54] sm:$0xf] }
 0x1a3   : > { %3627 = vmatpush.bf16.msk.msrb.mxu2 %vm4532_vm1, %v4468_v43  ;;  %v3467_v49 = vld [vmem:[%s5893_s3 + $0x68] sm:$0xf0] }
 0x1a6   : > { %v978_v47 = vpop.f32.mrf.mxu0  ;;  %v1183_v28 = vpop.f32.mrf.mxu1 }
 0x1a7   : > { %v979_v60 = vadd.f32 %v978_v47, %v4405_v57  ;;  %v1184_v43 = vadd.f32 %v1183_v28, %v4405_v57  ;;  %3630 = vmatpush.bf16.msk.msrb.mxu2 %vm4532_vm1, %v4462_v40  ;;  %v969_v57 = vadd.f32 %v968_v48, %v4409_v59  ;;  %v4812_v40 = vpack.c.bf16 %v974_v23, %v972_v55  ;;  %v3395_v55 = vld [vmem:[%s5893_s3 + $0x38] sm:$0xf0] }
 0x1a8   : > { %v962_v48 = vadd.f32 %v961_v34, %v4421_v0  ;;  %v964_v59 = vadd.f32 %v963_v37, %v4444_v11  ;;  %v3473_v34 = vld [vmem:[%s5893_s3 + $0x70] sm:$0xf]  ;;  %v3981_v11 = vld [vmem:[%s5893_s3 + $0x74] sm:$0xf0]  ;;  %v957_v37 = vadd.f32 %v4701_v26, %v4453_v17  ;;  %v686_v0 = vpop.permute.xlu0 %685  ;;  %v954_v26 = vadd.f32 %v4685_v12, %v4451_v16 }
 0x1a9   : > { %v4797_v41 = vpack.c.bf16 %v979_v60, %v977_v19  ;;  %v4799_v6 = vpack.c.bf16 %v1184_v43, %v1182_v8  ;;  %v4814_v60 = vpack.c.bf16 %v1179_v51, %v1177_v10  ;;  %v4827_v51 = vpack.c.bf16 %v969_v57, %v967_v3  ;;  %v3379_v43 = vld [vmem:[%s5893_s3 + $0x18] sm:$0xf0]  ;;  %v3974_v57 = vld [vmem:[%s5893_s3 + $0x44] sm:$0xf] }
 0x1aa   : > { %1440 = vmatmul.bf16.gmra.mxu2 %v4786_v15  ;;  %v4851_v38 = vpack.c.bf16 %v964_v59, %v962_v48  ;;  %v4855_v20 = vor.u32 %v3981_v11, %v3473_v34  ;;  %v4871_v52 = vpack.c.bf16 %v959_v2, %v957_v37  ;;  %v4873_v17 = vpack.c.bf16 %v1164_v53, %v1162_v25  ;;  %v3459_v48 = vld [vmem:[%s5893_s3 + $0x58] sm:$0xf0]  ;;  %v3537_v34 = vld [vmem:[%s5893_s3 + $0x90] sm:$0xf]  ;;  %v3985_v11 = vld [vmem:[%s5893_s3 + $0x94] sm:$0xf0] }
 0x1ab   : > { %3425 = vmatpush.bf16.msk.msra.mxu3 %vm4532_vm1, %v4799_v6  ;;  %3681 = vmatpush.bf16.msk.msra.mxu1 %vm4532_vm1, %v4797_v41  ;;  %v947_v16 = vadd.f32 %v4616_v7, %v4457_v21  ;;  %v949_v54 = vadd.f32 %v4644_v45, %v686_v0  ;;  %v1154_v12 = vadd.f32 %v4646_v46, %v686_v0  ;;  %v3966_v21 = vld [vmem:[%s5893_s3 + $0x4] sm:$0xf]  ;;  %v3980_v0 = vld [vmem:[%s5893_s3 + $0x74] sm:$0xf]  ;;  %v3475_v2 = vld [vmem:[%s5893_s3 + $0x78] sm:$0xf0] }
 0x1ac   : > { %v4888_v14 = vpack.c.bf16 %v954_v26, %v952_v13  ;;  %v4890_v23 = vpack.c.bf16 %v1159_v29, %v1157_v56  ;;  %v944_v45 = vadd.f32 %v4594_v32, %v676_v18  ;;  %v1149_v46 = vadd.f32 %v4596_v33, %v676_v18  ;;  %v3529_v32 = vld [vmem:[%s5893_s3 + $0x80] sm:$0xf]  ;;  %v3987_v26 = vld [vmem:[%s5893_s3 + $0xa4] sm:$0xf0]  ;;  %v3531_v56 = vld [vmem:[%s5893_s3 + $0x88] sm:$0xf0] }
 0x1ad   : > { %v4903_v44 = vpack.c.bf16 %v949_v54, %v947_v16  ;;  %v4905_v47 = vpack.c.bf16 %v1154_v12, %v1152_v35  ;;  %v5035_v3 = vor.u32 %v3974_v57, %v3451_v61  ;;  %v5053_v59 = vor.u32 %v3976_v62, %v3459_v48  ;;  %v3545_v13 = vld [vmem:[%s5893_s3 + $0xa0] sm:$0xf]  ;;  %v3989_v35 = vld [vmem:[%s5893_s3 + $0xb4] sm:$0xf0] }
 0x1ae   : > { %v5086_v37 = vor.u32 %v3985_v11, %v3537_v34  ;;  %v5104_v29 = vor.u32 %v3987_v26, %v3545_v13 }
 0x1af   : > { %3428 = vmatpush.bf16.msk.msra.mxu3 %vm4532_vm1, %v4814_v60  ;;  %3684 = vmatpush.bf16.msk.msra.mxu1 %vm4532_vm1, %v4812_v40 }
 0x1b0   : > { %v671_v63 = vpop.permute.xlu0 %670 }
 0x1b1   : > { %v942_v7 = vadd.f32 %v4558_v4, %v671_v63  ;;  %v1147_v31 = vadd.f32 %v4560_v50, %v671_v63  ;;  %v3371_v4 = vld [vmem:[%s5893_s3 + $0x8] sm:$0xf0]  ;;  %v3983_v50 = vld [vmem:[%s5893_s3 + $0x84] sm:$0xf0]  ;;  %v3553_v63 = vld [vmem:[%s5893_s3 + $0xb0] sm:$0xf] }
 0x1b2   : > { %v3374_v19 = vor.u32 %v3966_v21, %v3371_v4  ;;  %v4930_v8 = vor.u32 %v3983_v50, %v3529_v32  ;;  %v5917_v32 = vld [vmem:[#allocation4_spill] sm:$0xff] }
 0x1b3   : > { %3431 = vmatpush.bf16.msk.msra.mxu3 %vm4532_vm1, %v4829_v9  ;;  %3687 = vmatpush.bf16.msk.msra.mxu1 %vm4532_vm1, %v4827_v51  ;;  %v4926_v33 = vpack.c.bf16 %v944_v45, %v942_v7  ;;  %v4928_v28 = vpack.c.bf16 %v1149_v46, %v1147_v31  ;;  %v5130_v7 = vor.u32 %v3989_v35, %v3553_v63  ;;  %v3539_v45 = vld [vmem:[%s5893_s3 + $0x98] sm:$0xf0] }
 0x1b7   : > { %3434 = vmatpush.bf16.msk.msra.mxu3 %vm4532_vm1, %v4853_v39  ;;  %3690 = vmatpush.bf16.msk.msra.mxu1 %vm4532_vm1, %v4851_v38 }
 0x1ba   : > { %1445 = vmatmul.bf16.gmra.mxu2 %v4855_v20 }
 0x1bb   : > { %3437 = vmatpush.bf16.msk.msra.mxu3 %vm4532_vm1, %v4873_v17  ;;  %3693 = vmatpush.bf16.msk.msra.mxu1 %vm4532_vm1, %v4871_v52 }
 0x1bf   : > { %3440 = vmatpush.bf16.msk.msra.mxu3 %vm4532_vm1, %v4890_v23  ;;  %3696 = vmatpush.bf16.msk.msra.mxu1 %vm4532_vm1, %v4888_v14 }
 0x1c3   : > { %3443 = vmatpush.bf16.msk.msra.mxu3 %vm4532_vm1, %v4905_v47  ;;  %3699 = vmatpush.bf16.msk.msra.mxu1 %vm4532_vm1, %v4903_v44 }
 0x1c7   : > { %3446 = vmatpush.bf16.msk.msra.mxu3 %vm4532_vm1, %v4928_v28  ;;  %3702 = vmatpush.bf16.msk.msra.mxu1 %vm4532_vm1, %v4926_v33 }
 0x1ca   : > { %1345 = vmatmul.bf16.vlgmr.msra.gmra.mxu3 %v3374_v19  ;;  %1536 = vmatmul.bf16.vlgmr.msra.gmra.mxu2 %v4930_v8 }
 0x1cb   : > { %3505 = vmatpush.bf16.msk.msrb.mxu3 %vm4532_vm1, %v4797_v41  ;;  %3705 = vmatpush.bf16.msk.msra.mxu2 %vm4532_vm1, %v4537_v24  ;;  %v3968_v24 = vld [vmem:[%s5893_s3 + $0x14] sm:$0xf] }
 0x1cc   : > { %1737 = vmatmul.bf16.vlgmr.msra.gmra.mxu1 %v3374_v19 }
 0x1cf   : > { %3508 = vmatpush.bf16.msk.msrb.mxu3 %vm4532_vm1, %v4812_v40  ;;  %3708 = vmatpush.bf16.msk.msra.mxu2 %vm4532_vm1, %v4544_v58  ;;  %v3382_v58 = vor.u32 %v3968_v24, %v3379_v43 }
 0x1d3   : > { %3511 = vmatpush.bf16.msk.msrb.mxu3 %vm4532_vm1, %v4827_v51  ;;  %3711 = vmatpush.bf16.msk.msra.mxu2 %vm4532_vm1, %v4563_v36  ;;  %v3387_v36 = vld [vmem:[%s5893_s3 + $0x28] sm:$0xf0] }
 0x1d7   : > { %3514 = vmatpush.bf16.msk.msrb.mxu3 %vm4532_vm1, %v4851_v38  ;;  %3714 = vmatpush.bf16.msk.msra.mxu2 %vm4532_vm1, %v4590_v30  ;;  %v5916_v30 = vld [vmem:[#allocation2_spill] sm:$0xff] }
 0x1da   : > { %1350 = vmatmul.bf16.gmra.mxu3 %v3382_v58  ;;  %1541 = vmatmul.bf16.gmra.mxu2 %v5086_v37 }
 0x1db   : > { %3517 = vmatpush.bf16.msk.msrb.mxu3 %vm4532_vm1, %v4871_v52  ;;  %3717 = vmatpush.bf16.msk.msra.mxu2 %vm4532_vm1, %v4496_v27  ;;  %v3970_v27 = vld [vmem:[%s5893_s3 + $0x24] sm:$0xf] }
 0x1dc   : > { %1742 = vmatmul.bf16.gmra.mxu1 %v3382_v58  ;;  %v5918_v58 = vld [vmem:[#allocation5_spill] sm:$0xff] }
 0x1df   : > { %3520 = vmatpush.bf16.msk.msrb.mxu3 %vm4532_vm1, %v4888_v14  ;;  %3720 = vmatpush.bf16.msk.msra.mxu2 %vm4532_vm1, %v4479_v5  ;;  %v3390_v5 = vor.u32 %v3970_v27, %v3387_v36  ;;  %v3988_v27 = vld [vmem:[%s5893_s3 + $0xb4] sm:$0xf]  ;;  %v3555_v36 = vld [vmem:[%s5893_s3 + $0xb8] sm:$0xf0] }
 0x1e0   : > { %v3558_v22 = vor.u32 %v3988_v27, %v3555_v36 }
 0x1e3   : > { %3523 = vmatpush.bf16.msk.msrb.mxu3 %vm4532_vm1, %v4903_v44  ;;  %3723 = vmatpush.bf16.msk.msra.mxu2 %vm4532_vm1, %v4466_v42  ;;  %v3972_v42 = vld [vmem:[%s5893_s3 + $0x34] sm:$0xf] }
 0x1e4   : > { %v3398_v10 = vor.u32 %v3972_v42, %v3395_v55 }
 0x1e7   : > { %3526 = vmatpush.bf16.msk.msrb.mxu3 %vm4532_vm1, %v4926_v33  ;;  %3726 = vmatpush.bf16.msk.msra.mxu2 %vm4532_vm1, %v5916_v30 }
 0x1ea   : > { %1355 = vmatmul.bf16.gmra.mxu3 %v3390_v5  ;;  %1546 = vmatmul.bf16.gmra.mxu2 %v5104_v29 }
 0x1eb   : > { %3585 = vmatpush.bf16.msk.msra.mxu3 %vm4532_vm1, %v4799_v6 }
 0x1ec   : > { %1747 = vmatmul.bf16.gmra.mxu1 %v3390_v5 }
 0x1ef   : > { %3588 = vmatpush.bf16.msk.msra.mxu3 %vm4532_vm1, %v4814_v60 }
 0x1f3   : > { %3591 = vmatpush.bf16.msk.msra.mxu3 %vm4532_vm1, %v4829_v9 }
 0x1f7   : > { %3594 = vmatpush.bf16.msk.msra.mxu3 %vm4532_vm1, %v4853_v39 }
 0x1fa   : > { %1360 = vmatmul.bf16.gmra.mxu3 %v3398_v10  ;;  %1551 = vmatmul.bf16.gmra.mxu2 %v5130_v7 }
 0x1fb   : > { %3597 = vmatpush.bf16.msk.msra.mxu3 %vm4532_vm1, %v4873_v17 }
 0x1fc   : > { %1752 = vmatmul.bf16.gmra.mxu1 %v3398_v10 }
 0x1ff   : > { %3600 = vmatpush.bf16.msk.msra.mxu3 %vm4532_vm1, %v4890_v23 }
 0x203   : > { %3603 = vmatpush.bf16.msk.msra.mxu3 %vm4532_vm1, %v4905_v47 }
 0x207   : > { %3606 = vmatpush.bf16.msk.msra.mxu3 %vm4532_vm1, %v4928_v28 }
 0x20a   : > { %1459 = vmatmul.bf16.vlgmr.msrb.gmra.mxu3 %v5035_v3 }
 0x20b   : > { %3633 = vmatpush.bf16.msk.msrb.mxu3 %vm4532_vm1, %v4799_v6  ;;  %v1317_v6 = vpop.f32.mrf.mxu2 }
 0x20f   : > { %3636 = vmatpush.bf16.msk.msrb.mxu3 %vm4532_vm1, %v4814_v60  ;;  %v3978_v60 = vld [vmem:[%s5893_s3 + $0x64] sm:$0xf] }
 0x213   : > { %3639 = vmatpush.bf16.msk.msrb.mxu3 %vm4532_vm1, %v4829_v9  ;;  %v5074_v9 = vor.u32 %v3978_v60, %v3467_v49  ;;  %v1319_v1 = vpop.f32.mrf.mxu2  ;;  %1650 = vmatmul.bf16.vlgmr.msrb.gmra.mxu2 %v5917_v32 }
 0x217   : > { %3642 = vmatpush.bf16.msk.msrb.mxu3 %vm4532_vm1, %v4853_v39  ;;  %v5095_v39 = vor.u32 %v3980_v0, %v3475_v2 }
 0x21a   : > { %1464 = vmatmul.bf16.gmra.mxu3 %v5053_v59 }
 0x21b   : > { %3645 = vmatpush.bf16.msk.msrb.mxu3 %vm4532_vm1, %v4873_v17  ;;  %v1322_v53 = vpop.f32.mrf.mxu2  ;;  %v3982_v17 = vld [vmem:[%s5893_s3 + $0x84] sm:$0xf] }
 0x21c   : > { %v5113_v54 = vor.u32 %v3982_v17, %v3531_v56 }
 0x21f   : > { %3648 = vmatpush.bf16.msk.msrb.mxu3 %vm4532_vm1, %v4890_v23 }
 0x223   : > { %3651 = vmatpush.bf16.msk.msrb.mxu3 %vm4532_vm1, %v4905_v47  ;;  %v1324_v25 = vpop.f32.mrf.mxu2  ;;  %1655 = vmatmul.bf16.gmra.mxu2 %v5918_v58  ;;  %v1709_v58 = vpop.f32.mrf.mxu0 }
 0x227   : > { %3654 = vmatpush.bf16.msk.msrb.mxu3 %vm4532_vm1, %v4928_v28 }
 0x22a   : > { %1469 = vmatmul.bf16.gmra.mxu3 %v5074_v9 }
 0x22b   : > { %v1327_v16 = vpop.f32.mrf.mxu2 }
 0x233   : > { %v1329_v12 = vpop.f32.mrf.mxu2  ;;  %1660 = vmatmul.bf16.gmra.mxu2 %v4786_v15 }
 0x23a   : > { %1474 = vmatmul.bf16.gmra.mxu3 %v5095_v39 }
 0x23b   : > { %v1332_v46 = vpop.f32.mrf.mxu2 }
 0x24a   : > { %1565 = vmatmul.bf16.vlgmr.msra.gmra.mxu3 %v5113_v54 }
 0x24b   : > { %3729 = vmatpush.bf16.msk.msra.mxu3 %vm4532_vm1, %v4797_v41  ;;  %v3984_v41 = vld [vmem:[%s5893_s3 + $0x94] sm:$0xf] }
 0x24d   : > { %v1346_v23 = vpop.f32.mrf.mxu3 }
 0x24e   : > { %v5119_v18 = vadd.f32 %v1346_v23, %v1317_v6 }
 0x24f   : > { %3732 = vmatpush.bf16.msk.msra.mxu3 %vm4532_vm1, %v4812_v40  ;;  %v5144_v40 = vor.u32 %v3984_v41, %v3539_v45 }
 0x253   : > { %3735 = vmatpush.bf16.msk.msra.mxu3 %vm4532_vm1, %v4827_v51  ;;  %v1334_v51 = vpop.f32.mrf.mxu2  ;;  %1665 = vmatmul.bf16.gmra.mxu2 %v4855_v20 }
 0x255   : > { %v1348_v47 = vpop.f32.mrf.mxu3 }
 0x256   : > { %v5142_v21 = vadd.f32 %v1348_v47, %v1319_v1 }
 0x257   : > { %3738 = vmatpush.bf16.msk.msra.mxu3 %vm4532_vm1, %v4851_v38  ;;  %v3986_v38 = vld [vmem:[%s5893_s3 + $0xa4] sm:$0xf] }
 0x25a   : > { %1570 = vmatmul.bf16.gmra.mxu3 %v5144_v40 }
 0x25b   : > { %3741 = vmatpush.bf16.msk.msra.mxu3 %vm4532_vm1, %v4871_v52  ;;  %v3547_v52 = vld [vmem:[%s5893_s3 + $0xa8] sm:$0xf0] }
 0x25c   : > { %v5170_v19 = vor.u32 %v3986_v38, %v3547_v52 }
 0x25d   : > { %v1351_v31 = vpop.f32.mrf.mxu3 }
 0x25e   : > { %v5153_v4 = vadd.f32 %v1351_v31, %v1322_v53 }
 0x25f   : > { %3744 = vmatpush.bf16.msk.msra.mxu3 %vm4532_vm1, %v4888_v14  ;;  %v1431_v14 = vpop.f32.mrf.mxu2 }
 0x263   : > { %3747 = vmatpush.bf16.msk.msra.mxu3 %vm4532_vm1, %v4903_v44 }
 0x265   : > { %v1353_v50 = vpop.f32.mrf.mxu3 }
 0x266   : > { %v5168_v28 = vadd.f32 %v1353_v50, %v1324_v25 }
 0x267   : > { %3750 = vmatpush.bf16.msk.msra.mxu3 %vm4532_vm1, %v4926_v33  ;;  %v1433_v43 = vpop.f32.mrf.mxu2  ;;  %1766 = vmatmul.bf16.vlgmr.msra.gmra.mxu2 %v4930_v8 }
 0x26a   : > { %1575 = vmatmul.bf16.gmra.mxu3 %v5170_v19 }
 0x26d   : > { %v1356_v44 = vpop.f32.mrf.mxu3 }
 0x26e   : > { %v5176_v24 = vadd.f32 %v1356_v44, %v1327_v16 }
 0x26f   : > { %v1436_v33 = vpop.f32.mrf.mxu2 }
 0x275   : > { %v1358_v5 = vpop.f32.mrf.mxu3 }
 0x276   : > { %v5185_v30 = vadd.f32 %v1358_v5, %v1329_v12 }
 0x277   : > { %v1438_v10 = vpop.f32.mrf.mxu2  ;;  %1771 = vmatmul.bf16.gmra.mxu2 %v5086_v37 }
 0x27a   : > { %1580 = vmatmul.bf16.gmra.mxu3 %v3558_v22 }
 0x27d   : > { %v1361_v42 = vpop.f32.mrf.mxu3 }
 0x27e   : > { %v5187_v55 = vadd.f32 %v1361_v42, %v1332_v46 }
 0x27f   : > { %v1441_v62 = vpop.f32.mrf.mxu2 }
 0x285   : > { %v1363_v57 = vpop.f32.mrf.mxu3 }
 0x286   : > { %v5190_v61 = vadd.f32 %v1363_v57, %v1334_v51 }
 0x287   : > { %v1443_v60 = vpop.f32.mrf.mxu2  ;;  %1776 = vmatmul.bf16.gmra.mxu2 %v5104_v29 }
 0x28a   : > { %1679 = vmatmul.bf16.vlgmr.msrb.gmra.mxu3 %v5035_v3 }
 0x28d   : > { %v1460_v48 = vpop.f32.mrf.mxu3 }
 0x28e   : > { %v5193_v6 = vadd.f32 %v1460_v48, %v1431_v14 }
 0x28f   : > { %v1446_v34 = vpop.f32.mrf.mxu2 }
 0x295   : > { %v1462_v49 = vpop.f32.mrf.mxu3 }
 0x296   : > { %v5196_v1 = vadd.f32 %v1462_v49, %v1433_v43 }
 0x297   : > { %v1448_v0 = vpop.f32.mrf.mxu2  ;;  %1781 = vmatmul.bf16.gmra.mxu2 %v5130_v7 }
 0x29a   : > { %1684 = vmatmul.bf16.gmra.mxu3 %v5053_v59 }
 0x29d   : > { %v1465_v11 = vpop.f32.mrf.mxu3 }
 0x29e   : > { %v5199_v15 = vadd.f32 %v1465_v11, %v1436_v33 }
 0x29f   : > { %v1537_v53 = vpop.f32.mrf.mxu2 }
 0x2a5   : > { %v1467_v2 = vpop.f32.mrf.mxu3 }
 0x2a6   : > { %v5202_v3 = vadd.f32 %v1467_v2, %v1438_v10 }
 0x2a7   : > { %v5207_v13 = vpop.f32.mrf.mxu2 }
 0x2aa   : > { %1689 = vmatmul.bf16.gmra.mxu3 %v5074_v9 }
 0x2ad   : > { %v1470_v25 = vpop.f32.mrf.mxu3 }
 0x2ae   : > { %v5205_v20 = vadd.f32 %v1470_v25, %v1441_v62 }
 0x2af   : > { %v1542_v17 = vpop.f32.mrf.mxu2 }
 0x2b5   : > { %v1472_v59 = vpop.f32.mrf.mxu3 }
 0x2b6   : > { %v5210_v26 = vadd.f32 %v1472_v59, %v1443_v60 }
 0x2b7   : > { %v5215_v16 = vpop.f32.mrf.mxu2 }
 0x2ba   : > { %1694 = vmatmul.bf16.gmra.mxu3 %v5095_v39 }
 0x2bd   : > { %v1475_v8 = vpop.f32.mrf.mxu3 }
 0x2be   : > { %v5213_v56 = vadd.f32 %v1475_v8, %v1446_v34 }
 0x2bf   : > { %v1547_v23 = vpop.f32.mrf.mxu2 }
 0x2c5   : > { %v1477_v9 = vpop.f32.mrf.mxu3 }
 0x2c6   : > { %v5218_v12 = vadd.f32 %v1477_v9, %v1448_v0 }
 0x2c7   : > { %v5223_v35 = vpop.f32.mrf.mxu2 }
 0x2ca   : > { %1795 = vmatmul.bf16.vlgmr.msra.gmra.mxu3 %v5113_v54  ;;  %v5235_v54 = vpop.f32.mrf.mxu1 }
 0x2cd   : > { %v1566_v37 = vpop.f32.mrf.mxu3 }
 0x2ce   : > { %v5221_v63 = vadd.f32 %v1566_v37, %v1537_v53 }
 0x2cf   : > { %v1552_v41 = vpop.f32.mrf.mxu2 }
 0x2d2   : > { %v5240_v32 = vpop.f32.mrf.mxu1 }
 0x2d5   : > { %v5226_v39 = vpop.f32.mrf.mxu3 }
 0x2d7   : > { %v5233_v47 = vpop.f32.mrf.mxu2 }
 0x2da   : > { %1800 = vmatmul.bf16.gmra.mxu3 %v5144_v40  ;;  %v5246_v52 = vpop.f32.mrf.mxu1 }
 0x2dd   : > { %v1571_v45 = vpop.f32.mrf.mxu3 }
 0x2de   : > { %v5229_v29 = vadd.f32 %v1571_v45, %v1542_v17 }
 0x2df   : > { %v1651_v7 = vpop.f32.mrf.mxu2 }
 0x2e5   : > { %v5231_v46 = vpop.f32.mrf.mxu3 }
 0x2e7   : > { %v5244_v40 = vpop.f32.mrf.mxu2 }
 0x2ea   : > { %1805 = vmatmul.bf16.gmra.mxu3 %v5170_v19  ;;  %v5252_v19 = vpop.f32.mrf.mxu1 }
 0x2ed   : > { %v1576_v51 = vpop.f32.mrf.mxu3 }
 0x2ee   : > { %v5238_v31 = vadd.f32 %v1576_v51, %v1547_v23 }
 0x2ef   : > { %v1656_v44 = vpop.f32.mrf.mxu2 }
 0x2f2   : > { %v1738_v33 = vpop.f32.mrf.mxu1 }
 0x2f5   : > { %v5242_v38 = vpop.f32.mrf.mxu3 }
 0x2f7   : > { %v5254_v36 = vpop.f32.mrf.mxu2 }
 0x2fa   : > { %1810 = vmatmul.bf16.gmra.mxu3 %v3558_v22 }
 0x2fd   : > { %v1581_v50 = vpop.f32.mrf.mxu3 }
 0x2fe   : > { %v5248_v14 = vadd.f32 %v1581_v50, %v1552_v41 }
 0x2ff   : > { %v1661_v57 = vpop.f32.mrf.mxu2 }
 0x305   : > { %v5250_v43 = vpop.f32.mrf.mxu3 }
 0x307   : > { %v5262_v60 = vpop.f32.mrf.mxu2 }
 0x30d   : > { %v1680_v27 = vpop.f32.mrf.mxu3 }
 0x30e   : > { %v1681_v5 = vadd.f32 %v1680_v27, %v1651_v7 }
 0x30f   : > { %v1666_v34 = vpop.f32.mrf.mxu2 }
 0x310   : > { %v1710_v42 = vadd.f32 %v1709_v58, %v1681_v5 }
 0x312   : > { %v5256_v10 = vadd.f32 %v1738_v33, %v1710_v42 }
 0x315   : > { %v5258_v22 = vpop.f32.mrf.mxu3 }
 0x317   : > { %v5270_v53 = vpop.f32.mrf.mxu2 }
 0x31d   : > { %v1685_v62 = vpop.f32.mrf.mxu3 }
 0x31e   : > { %v5260_v48 = vadd.f32 %v1685_v62, %v1656_v44 }
 0x31f   : > { %v1767_v17 = vpop.f32.mrf.mxu2 }
 0x325   : > { %v5264_v49 = vpop.f32.mrf.mxu3 }
 0x327   : > { %v1769_v9 = vpop.f32.mrf.mxu2 }
 0x32d   : > { %v1690_v11 = vpop.f32.mrf.mxu3 }
 0x32e   : > { %v5266_v0 = vadd.f32 %v1690_v11, %v1661_v57 }
 0x32f   : > { %v1772_v41 = vpop.f32.mrf.mxu2 }
 0x335   : > { %v5268_v2 = vpop.f32.mrf.mxu3 }
 0x337   : > { %v1774_v51 = vpop.f32.mrf.mxu2 }
 0x33d   : > { %v1695_v25 = vpop.f32.mrf.mxu3 }
 0x33e   : > { %v5272_v59 = vadd.f32 %v1695_v25, %v1666_v34 }
 0x33f   : > { %v1777_v27 = vpop.f32.mrf.mxu2 }
 0x345   : > { %v5274_v8 = vpop.f32.mrf.mxu3 }
 0x347   : > { %v1779_v42 = vpop.f32.mrf.mxu2 }
 0x34d   : > { %v1796_v23 = vpop.f32.mrf.mxu3 }
 0x34e   : > { %v1797_v37 = vadd.f32 %v1796_v23, %v1767_v17 }
 0x34f   : > { %v1782_v34 = vpop.f32.mrf.mxu2 }
 0x350   : > { %1816 = vrot.lane.b32.xlu2 %v1797_v37, %s4181_s28  ;;  %v1261_v37 = vld [vmem:[%s5894_s4 + $0x8] sm:$0xff] }
 0x355   : > { %v1798_v45 = vpop.f32.mrf.mxu3 }
 0x357   : > { %v1784_v17 = vpop.f32.mrf.mxu2 }
 0x35d   : > { %v1801_v7 = vpop.f32.mrf.mxu3 }
 0x35e   : > { %v1802_v50 = vadd.f32 %v1801_v7, %v1772_v41 }
 0x360   : > { %1820 = vrot.lane.b32.xlu1 %v1802_v50, %s4181_s28 }
 0x365   : > { %v1803_v44 = vpop.f32.mrf.mxu3 }
 0x366   : > { %v1804_v58 = vadd.f32 %v1803_v44, %v1774_v51  ;;  %v1799_v51 = vadd.f32 %v1798_v45, %v1769_v9  ;;  %v5322_v9 = vpop.f32.mrf.mxu1  ;;  %v2458_v45 = vld [vmem:[%s5898_s8 + $0x68] sm:$0xff] }
 0x368   : > { %1822 = vrot.lane.b32.xlu2 %v1804_v58, %s4181_s28  ;;  %v2451_v58 = vld [vmem:[%s5898_s8 + $0x30] sm:$0xff] }
 0x36d   : > { %v1806_v5 = vpop.f32.mrf.mxu3 }
 0x36e   : > { %v1807_v33 = vadd.f32 %v1806_v5, %v1777_v27  ;;  %v1743_v44 = vpop.f32.mrf.mxu1  ;;  %v2456_v27 = vld [vmem:[%s5898_s8 + $0x58] sm:$0xff]  ;;  %v5338_v5 = vpop.permute.xlu1 %1626 }
 0x370   : > { %1824 = vrot.lane.b32.xlu0 %v1807_v33, %s4181_s28 }
 0x375   : > { %v1808_v57 = vpop.f32.mrf.mxu3 }
 0x376   : > { %v1809_v62 = vadd.f32 %v1808_v57, %v1779_v42  ;;  %v1688_v42 = vadd.f32 %v5264_v49, %v5254_v36  ;;  %v2452_v36 = vld [vmem:[%s5898_s8 + $0x38] sm:$0xff] }
 0x378   : > { %1826 = vrot.lane.b32.xlu1 %v1809_v62, %s4181_s28 }
 0x37d   : > { %v1811_v11 = vpop.f32.mrf.mxu3 }
 0x37e   : > { %v1812_v25 = vadd.f32 %v1811_v11, %v1782_v34  ;;  %v1745_v34 = vpop.f32.mrf.mxu1  ;;  %v2454_v11 = vld [vmem:[%s5898_s8 + $0x48] sm:$0xff] }
 0x380   : > { %1378 = vrot.lane.b32.xlu1 %v5187_v55, %s4182_s15  ;;  %1828 = vrot.lane.b32.xlu2 %v1812_v25, %s4181_s28  ;;  %v1260_v55 = vld [vmem:[%s5894_s4] sm:$0xff] }
 0x385   : > { %v1813_v23 = vpop.f32.mrf.mxu3 }
 0x386   : > { %v1814_v41 = vadd.f32 %v1813_v23, %v1784_v17  ;;  %v5347_v23 = vpop.permute.xlu0 %1621 }
 0x388   : > { %1601 = vperm.xlu1 %4170, %v1261_v37   ;;  %1380 = vrot.lane.b32.xlu2 %v5190_v61, %s4182_s15  ;;  %v5317_v61 = vpop.f32.mrf.mxu0  ;;  %v5349_v37 = vpop.permute.xlu1 %1611 }
 0x389   : > { %1830 = vrot.lane.b32.xlu0 %v1814_v41, %s4181_s28 }
 0x390   : > { %1370 = vrot.lane.b32.xlu1 %v5153_v4, %s4182_s15  ;;  %1374 = vrot.lane.b32.xlu2 %v5176_v24, %s4182_s15  ;;  %v2459_v4 = vld [vmem:[%s5898_s8 + $0x70] sm:$0xff]  ;;  %v2457_v24 = vld [vmem:[%s5898_s8 + $0x60] sm:$0xff]  ;;  %v1714_v50 = vpop.f32.mrf.mxu0 }
 0x391   : > { %1818 = vrot.lane.b32.xlu0 %v1799_v51, %s4181_s28  ;;  %v1715_v51 = vadd.f32 %v1714_v50, %v5260_v48 }
 0x398   : > { %1368 = vrot.lane.b32.xlu1 %v5142_v21, %s4182_s15  ;;  %1372 = vrot.lane.b32.xlu2 %v5168_v28, %s4182_s15  ;;  %v2455_v21 = vld [vmem:[%s5898_s8 + $0x50] sm:$0xff]  ;;  %v5315_v28 = vpop.permute.xlu2 %1631  ;;  %v1716_v57 = vpop.f32.mrf.mxu0 }
 0x399   : > { %1596 = vperm.xlu0 %4169, %v1260_v55   ;;  %v1717_v62 = vadd.f32 %v1716_v57, %v1688_v42  ;;  %v1744_v55 = vadd.f32 %v1743_v44, %v1715_v51 }
 0x39b   : > { %v1746_v17 = vadd.f32 %v1745_v34, %v1717_v62  ;;  %v1720_v34 = vadd.f32 %v5235_v54, %v5266_v0  ;;  %v1725_v54 = vadd.f32 %v5246_v52, %v5272_v59 }
 0x3a0   : > { %2533 = vperm.xlu2 %4171, %v2459_v4   ;;  %v5330_v7 = vpop.permute.xlu2 %1616 }
 0x3a1   : > { %1376 = vrot.lane.b32.xlu0 %v5185_v30, %s4182_s15  ;;  %v2460_v30 = vld [vmem:[%s5898_s8 + $0x78] sm:$0xff] }
 0x3a8   : > { %2523 = vperm.xlu2 %4171, %v2457_v24  }
 0x3a9   : > { %1366 = vrot.lane.b32.xlu0 %v5119_v18, %s4182_s15  ;;  %v2453_v18 = vld [vmem:[%s5898_s8 + $0x40] sm:$0xff] }
 0x3aa   : > { %v5340_v33 = vpop.permute.xlu2 %1816 }
 0x3b0   : > { %2513 = vperm.xlu2 %4171, %v2455_v21  }
 0x3b1   : > { %2538 = vperm.xlu0 %4169, %v2460_v30   ;;  %v5356_v30 = vpop.permute.xlu0 %1606 }
 0x3b8   : > { %2503 = vperm.xlu2 %4171, %v2453_v18  }
 0x3b9   : > { %2528 = vperm.xlu0 %4169, %v2458_v45   ;;  %v1748_v45 = vpop.f32.mrf.mxu1 }
 0x3c0   : > { %2493 = vperm.xlu2 %4171, %v2451_v58  }
 0x3c1   : > { %2518 = vperm.xlu0 %4169, %v2456_v27  }
 0x3c2   : > { %v1823_v25 = vpop.permute.xlu2 %1822 }
 0x3c3   : > { %v1835_v41 = vadd.f32 %v1823_v25, %v1746_v17  ;;  %v1750_v25 = vpop.f32.mrf.mxu1  ;;  %v1749_v17 = vadd.f32 %v1748_v45, %v1720_v34 }
 0x3c5   : > { %v1843_v49 = vadd.f32 %v1835_v41, %v5349_v37 }
 0x3c7   : > { %v1891_v24 = vmul.f32 0.2, %v1843_v49  ;;  %vm1883_vm2 = vcmp.ge.f32.partialorder %v1843_v49, 0.0 }
 0x3c9   : > { %2508 = vperm.xlu0 %4169, %v2454_v11   ;;  %v1899_v58 = vsel %vm1883_vm2, %v1843_v49, %v1891_v24  ;;  %v1693_v11 = vadd.f32 %v5268_v2, %v5262_v60 }
 0x3ca   : > { %v5373_v57 = vsel %vm981_vm0, %v1899_v58, 0.0 }
 0x3cb   : > { %v1722_v49 = vadd.f32 %v5240_v32, %v1693_v11  ;;  %v1753_v2 = vpop.f32.mrf.mxu1 }
 0x3d1   : > { %2498 = vperm.xlu0 %4169, %v2452_v36  }
 0x3d2   : > { %v1821_v4 = vpop.permute.xlu1 %1820 }
 0x3d3   : > { %v1834_v21 = vadd.f32 %v1821_v4, %v1744_v55  ;;  %v1584_v4 = vadd.f32 %v5250_v43, %v5233_v47  ;;  %v1754_v43 = vadd.f32 %v1753_v2, %v1725_v54 }
 0x3d5   : > { %v1842_v18 = vadd.f32 %v1834_v21, %v5356_v30  ;;  %v1751_v21 = vadd.f32 %v1750_v25, %v1722_v49 }
 0x3d7   : > { %vm1882_vm3 = vcmp.ge.f32.partialorder %v1842_v18, 0.0  ;;  %v1890_v48 = vmul.f32 0.2, %v1842_v18 }
 0x3d9   : > { %v1898_v50 = vsel %vm1882_vm3, %v1842_v18, %v1890_v48  ;;  %vm2323_vm3 = vcmask 523264  }
 0x3da   : > { %v1829_v27 = vpop.permute.xlu2 %1828  ;;  %v5369_v42 = vsel %vm981_vm0, %v1898_v50, 0.0 }
 0x3db   : > { %v4054_v62 = vpack.c.bf16 %v5373_v57, %v5369_v42 }
 0x3dd   : > { %4130 = vst [vmem:[%s5365_s19 + $0x28] sm:$0xff] %v4054_v62   ;;  %v1838_v62 = vadd.f32 %v1829_v27, %v1754_v43 }
 0x3df   : > { %v1846_v27 = vadd.f32 %v1838_v62, %v5338_v5 }
 0x3e1   : > { %vm1886_vm7 = vcmp.ge.f32.partialorder %v1846_v27, 0.0 }
 0x3e2   : > { %v1825_v41 = vpop.permute.xlu0 %1824  ;;  %v1381_v51 = vpop.permute.xlu2 %1380 }
 0x3e3   : > { %v1836_v36 = vadd.f32 %v1825_v41, %v1749_v17  ;;  %v1487_v55 = vadd.f32 %v5218_v12, %v1381_v51 }
 0x3e5   : > { %v1844_v24 = vadd.f32 %v1836_v36, %v5330_v7  ;;  %v1593_v18 = vadd.f32 %v1584_v4, %v1487_v55  ;;  %v1574_v55 = vadd.f32 %v5231_v46, %v5215_v16 }
 0x3e7   : > { %v1892_v48 = vmul.f32 0.2, %v1844_v24  ;;  %vm1884_vm4 = vcmp.ge.f32.partialorder %v1844_v24, 0.0  ;;  %v1641_v12 = vadd.f32 %v5315_v28, %v1593_v18 }
 0x3e9   : > { %v1900_v52 = vsel %vm1884_vm4, %v1844_v24, %v1892_v48  ;;  %v1863_v59 = vmul.f32 0.2, %v1641_v12  ;;  %vm1855_vm6 = vcmp.ge.f32.partialorder %v1641_v12, 0.0  ;;  %v1894_v24 = vmul.f32 0.2, %v1846_v27 }
 0x3ea   : > { %v1827_v60 = vpop.permute.xlu1 %1826  ;;  %v1375_v0 = vpop.permute.xlu2 %1374  ;;  %v5402_v41 = vsel %vm981_vm0, %v1900_v52, 0.0 }
 0x3eb   : > { %v1837_v45 = vadd.f32 %v1827_v60, %v1751_v21  ;;  %v1484_v58 = vadd.f32 %v5205_v20, %v1375_v0  ;;  %v1698_v20 = vadd.f32 %v5274_v8, %v5270_v53  ;;  %v1871_v36 = vsel %vm1855_vm6, %v1641_v12, %v1863_v59 }
 0x3ec   : > { %v1879_v21 = vsel %vm981_vm0, %v1871_v36, 0.0  ;;  %v1902_v0 = vsel %vm1886_vm7, %v1846_v27, %v1894_v24 }
 0x3ed   : > { %v1845_v32 = vadd.f32 %v1837_v45, %v5347_v23  ;;  %v5393_v47 = vadd.f32 %v5238_v31, %v1484_v58  ;;  %v1727_v8 = vadd.f32 %v5252_v19, %v1698_v20  ;;  %v1919_v46 = vpack.c.bf16 %v1879_v21, %v1879_v21 }
 0x3ef   : > { %vm1885_vm5 = vcmp.ge.f32.partialorder %v1845_v32, 0.0  ;;  %v1893_v50 = vmul.f32 0.2, %v1845_v32  ;;  %v1960_v43 = vunpack.c.l.b16 %v1919_v46 }
 0x3f1   : > { %v1901_v34 = vsel %vm1885_vm5, %v1845_v32, %v1893_v50 }
 0x3f2   : > { %v1379_v11 = vpop.permute.xlu1 %1378  ;;  %v1373_v25 = vpop.permute.xlu2 %1372  ;;  %v1909_v17 = vsel %vm981_vm0, %v1901_v34, 0.0 }
 0x3f3   : > { %v1486_v31 = vadd.f32 %v5213_v56, %v1379_v11  ;;  %v4059_v51 = vpack.c.bf16 %v1909_v17, %v5402_v41  ;;  %v1483_v53 = vadd.f32 %v5202_v3, %v1373_v25  ;;  %v1755_v56 = vpop.f32.mrf.mxu1  ;;  %v1683_v3 = vadd.f32 %v5258_v22, %v5244_v40 }
 0x3f4   : > { %v1910_v40 = vsel %vm981_vm0, %v1902_v0, 0.0  ;;  %v1933_v25 = vpack.c.bf16 %v1909_v17, %v1909_v17 }
 0x3f5   : > { %v1592_v49 = vadd.f32 %v5248_v14, %v1486_v31  ;;  %4131 = vst [vmem:[%s5365_s19 + $0x30] sm:$0xff] %v4059_v51   ;;  %v1589_v54 = vadd.f32 %v1574_v55, %v1483_v53  ;;  %v1756_v14 = vadd.f32 %v1755_v56, %v1727_v8  ;;  %v1712_v12 = vadd.f32 %v5317_v61, %v1683_v3 }
 0x3f6   : > { %v1932_v55 = vpack.c.bf16 %v5402_v41, %v5402_v41  ;;  %v1832_v41 = vadd.f32 %v5340_v33, %v5256_v10 }
 0x3f7   : > { %v1640_v4 = vadd.f32 %v5338_v5, %v1592_v49  ;;  %v1637_v58 = vadd.f32 %v5349_v37, %v1589_v54  ;;  %v1741_v59 = vadd.f32 %v5322_v9, %v1712_v12  ;;  %v1934_v37 = vpack.c.bf16 %v1910_v40, %v1910_v40 }
 0x3f9   : > { %vm1854_vm8 = vcmp.ge.f32.partialorder %v1640_v4, 0.0  ;;  %v1862_v18 = vmul.f32 0.2, %v1640_v4  ;;  %v1859_v62 = vmul.f32 0.2, %v1637_v58  ;;  %vm1851_vm10 = vcmp.ge.f32.partialorder %v1637_v58, 0.0 }
 0x3fa   : > { %v5417_v19 = vpop.permute.xlu1 %1601  ;;  %v1983_v53 = vunpack.c.l.b16 %v1934_v37 }
 0x3fb   : > { %v1870_v60 = vsel %vm1854_vm8, %v1640_v4, %v1862_v18  ;;  %v1831_v16 = vpop.permute.xlu0 %1830  ;;  %v1867_v36 = vsel %vm1851_vm10, %v1637_v58, %v1859_v62  ;;  %v1982_v4 = vunpack.c.l.b16 %v1933_v25  ;;  %v1931_v18 = vpack.c.bf16 %v5373_v57, %v5373_v57 }
 0x3fc   : > { %v1878_v5 = vsel %vm981_vm0, %v1870_v60, 0.0  ;;  %v1839_v2 = vadd.f32 %v1831_v16, %v1756_v14  ;;  %v1875_v17 = vsel %vm981_vm0, %v1867_v36, 0.0 }
 0x3fd   : > { %v4044_v45 = vpack.c.bf16 %v1879_v21, %v1878_v5  ;;  %v1918_v48 = vpack.c.bf16 %v1878_v5, %v1878_v5  ;;  %v1915_v60 = vpack.c.bf16 %v1875_v17, %v1875_v17  ;;  %v1980_v10 = vunpack.c.l.b16 %v1931_v18 }
 0x3fe   : > { %v1847_v32 = vadd.f32 %v1839_v2, %v5315_v28 }
 0x3ff   : > { %4128 = vst [vmem:[%s5365_s19 + $0x18] sm:$0xff] %v4044_v45   ;;  %v1959_v22 = vunpack.c.l.b16 %v1918_v48  ;;  %v1638_v45 = vadd.f32 %v5330_v7, %v5393_v47 }
 0x400   : > { %vm1887_vm9 = vcmp.ge.f32.partialorder %v1847_v32, 0.0  ;;  %v1895_v50 = vmul.f32 0.2, %v1847_v32 }
 0x401   : > { %v5427_v52 = vpack.c.b16 %v1960_v43, %v1959_v22  ;;  %vm1852_vm14 = vcmp.ge.f32.partialorder %v1638_v45, 0.0 }
 0x402   : > { %v1903_v34 = vsel %vm1887_vm9, %v1847_v32, %v1895_v50  ;;  %v1371_v61 = vpop.permute.xlu1 %1370  ;;  %v1956_v32 = vunpack.c.l.b16 %v1915_v60  ;;  %v3998_v60 = vld [vmem:[%s5896_s6] sm:$0xff] }
 0x403   : > { %v1911_v28 = vsel %vm981_vm0, %v1903_v34, 0.0  ;;  %v1482_v20 = vadd.f32 %v5199_v15, %v1371_v61  ;;  %v1819_v11 = vpop.permute.xlu0 %1818  ;;  %v1930_v15 = vpack.c.bf16 %v5369_v42, %v5369_v42 }
 0x404   : > { %v1935_v31 = vpack.c.bf16 %v1911_v28, %v1911_v28  ;;  %v4064_v27 = vpack.c.bf16 %v1911_v28, %v1910_v40  ;;  %v1833_v51 = vadd.f32 %v1819_v11, %v1741_v59  ;;  %v1569_v40 = vadd.f32 %v5226_v39, %v5207_v13 }
 0x405   : > { %v1588_v49 = vadd.f32 %v5229_v29, %v1482_v20  ;;  %v1979_v0 = vunpack.c.l.b16 %v1930_v15  ;;  %v1579_v13 = vadd.f32 %v5242_v38, %v5223_v35 }
 0x406   : > { %4132 = vst [vmem:[%s5365_s19 + $0x38] sm:$0xff] %v4064_v27   ;;  %v1841_v9 = vadd.f32 %v1833_v51, %v5417_v19  ;;  %v1984_v8 = vunpack.c.l.b16 %v1935_v31 }
 0x407   : > { %v1636_v56 = vadd.f32 %v5356_v30, %v1588_v49  ;;  %v1981_v30 = vunpack.c.l.b16 %v1932_v55  ;;  %v1986_v43 = vpack.c.b16 %v1980_v10, %v1979_v0  ;;  %v4007_v0 = vld [vmem:[%s5897_s7 + $0x8] sm:$0xff]  ;;  %v3993_v10 = vld [vmem:[%s5895_s5 + $0x18] sm:$0xff] }
 0x408   : > { %vm1881_vm11 = vcmp.ge.f32.partialorder %v1841_v9, 0.0  ;;  %v1889_v24 = vmul.f32 0.2, %v1841_v9  ;;  %v1988_v29 = vpack.c.b16 %v1984_v8, %v1983_v53 }
 0x409   : > { %vm1850_vm12 = vcmp.ge.f32.partialorder %v1636_v56, 0.0  ;;  %v1858_v21 = vmul.f32 0.2, %v1636_v56  ;;  %v1987_v57 = vpack.c.b16 %v1982_v4, %v1981_v30 }
 0x40a   : > { %v1897_v54 = vsel %vm1881_vm11, %v1841_v9, %v1889_v24  ;;  %2057 = vmatpush.bf16.msra.mxu0 %v1988_v29  ;;  %4150 = vmatpush.bf16.msrb.mxu2 %v1988_v29  ;;  %v1369_v42 = vpop.permute.xlu1 %1368 }
 0x40b   : > { %v1866_v3 = vsel %vm1850_vm12, %v1636_v56, %v1858_v21  ;;  %2202 = vmatpush.bf16.msrb.mxu1 %v1988_v29  ;;  %v5447_v14 = vpop.permute.xlu0 %1596  ;;  %v1905_v33 = vsel %vm981_vm0, %v1897_v54, 0.0  ;;  %v1481_v58 = vadd.f32 %v5196_v1, %v1369_v42  ;;  %v1860_v1 = vmul.f32 0.2, %v1638_v45  ;;  %v3990_v42 = vld [vmem:[%s5895_s5] sm:$0xff] }
 0x40c   : > { %v1874_v16 = vsel %vm981_vm0, %v1866_v3, 0.0  ;;  %v1840_v46 = vadd.f32 %v1832_v41, %v5447_v14  ;;  %v1929_v50 = vpack.c.bf16 %v1905_v33, %v1905_v33 }
 0x40d   : > { %v4034_v5 = vpack.c.bf16 %v1875_v17, %v1874_v16  ;;  %v1914_v2 = vpack.c.bf16 %v1874_v16, %v1874_v16  ;;  %v1587_v62 = vadd.f32 %v1569_v40, %v1481_v58  ;;  %v1868_v20 = vsel %vm1852_vm14, %v1638_v45, %v1860_v1  ;;  %v3991_v16 = vld [vmem:[%s5895_s5 + $0x8] sm:$0xff]  ;;  %v3994_v45 = vld [vmem:[%s5895_s5 + $0x20] sm:$0xff]  ;;  %v4009_v58 = vld [vmem:[%s5897_s7 + $0x18] sm:$0xff] }
 0x40e   : > { %vm1880_vm13 = vcmp.ge.f32.partialorder %v1840_v46, 0.0  ;;  %v1888_v48 = vmul.f32 0.2, %v1840_v46  ;;  %2058 = vmatpush.bf16.msra.mxu0 %v1987_v57  ;;  %4151 = vmatpush.bf16.msrb.mxu2 %v1987_v57  ;;  %v1978_v28 = vunpack.c.l.b16 %v1929_v50  ;;  %v1876_v51 = vsel %vm981_vm0, %v1868_v20, 0.0  ;;  %v4003_v40 = vld [vmem:[%s5896_s6 + $0x28] sm:$0xff]  ;;  %v4004_v50 = vld [vmem:[%s5896_s6 + $0x30] sm:$0xff] }
 0x40f   : > { %4126 = vst [vmem:[%s5365_s19 + $0x8] sm:$0xff] %v4034_v5   ;;  %2203 = vmatpush.bf16.msrb.mxu1 %v1987_v57  ;;  %v1955_v12 = vunpack.c.l.b16 %v1914_v2  ;;  %v1635_v11 = vadd.f32 %v5417_v19, %v1587_v62  ;;  %v3999_v57 = vld [vmem:[%s5896_s6 + $0x8] sm:$0xff]  ;;  %v4000_v5 = vld [vmem:[%s5896_s6 + $0x10] sm:$0xff]  ;;  %v4001_v2 = vld [vmem:[%s5896_s6 + $0x18] sm:$0xff] }
 0x410   : > { %v1896_v22 = vsel %vm1880_vm13, %v1840_v46, %v1888_v48  ;;  %v4006_v46 = vld [vmem:[%s5897_s7] sm:$0xff]  ;;  %v4013_v1 = vld [vmem:[%s5897_s7 + $0x38] sm:$0xff] }
 0x411   : > { %v1904_v7 = vsel %vm981_vm0, %v1896_v22, 0.0  ;;  %v5462_v47 = vpack.c.b16 %v1956_v32, %v1955_v12  ;;  %v1857_v36 = vmul.f32 0.2, %v1635_v11  ;;  %vm1849_vm1 = vcmp.ge.f32.partialorder %v1635_v11, 0.0  ;;  %v4002_v48 = vld [vmem:[%s5896_s6 + $0x20] sm:$0xff]  ;;  %v3995_v12 = vld [vmem:[%s5895_s5 + $0x28] sm:$0xff] }
 0x412   : > { %2059 = vmatpush.bf16.msra.mxu0 %v1986_v43  ;;  %4152 = vmatpush.bf16.msrb.mxu2 %v1986_v43  ;;  %v1928_v59 = vpack.c.bf16 %v1904_v7, %v1904_v7  ;;  %v4049_v37 = vpack.c.bf16 %v1905_v33, %v1904_v7  ;;  %v4008_v33 = vld [vmem:[%s5897_s7 + $0x10] sm:$0xff]  ;;  %v4010_v32 = vld [vmem:[%s5897_s7 + $0x20] sm:$0xff] }
 0x413   : > { %2204 = vmatpush.bf16.msrb.mxu1 %v1986_v43  ;;  %v1377_v34 = vpop.permute.xlu0 %1376  ;;  %v1865_v9 = vsel %vm1849_vm1, %v1635_v11, %v1857_v36  ;;  %v3996_v22 = vld [vmem:[%s5895_s5 + $0x30] sm:$0xff]  ;;  %v4011_v43 = vld [vmem:[%s5897_s7 + $0x28] sm:$0xff] }
 0x414   : > { %v1485_v39 = vadd.f32 %v5210_v26, %v1377_v34  ;;  %4129 = vst [vmem:[%s5365_s19 + $0x20] sm:$0xff] %v4049_v37   ;;  %v1977_v61 = vunpack.c.l.b16 %v1928_v59  ;;  %v1873_v15 = vsel %vm981_vm0, %v1865_v9, 0.0  ;;  %v4012_v7 = vld [vmem:[%s5897_s7 + $0x30] sm:$0xff] }
 0x415   : > { %v1913_v21 = vpack.c.bf16 %v1873_v15, %v1873_v15 }
 0x416   : > { %v1591_v25 = vadd.f32 %v1579_v13, %v1485_v39  ;;  %v1985_v31 = vpack.c.b16 %v1978_v28, %v1977_v61 }
 0x417   : > { %v1954_v30 = vunpack.c.l.b16 %v1913_v21 }
 0x418   : > { %v1639_v27 = vadd.f32 %v5347_v23, %v1591_v25  ;;  %2060 = vmatpush.bf16.msra.mxu0 %v1985_v31  ;;  %4153 = vmatpush.bf16.msrb.mxu2 %v1985_v31  ;;  %v1916_v23 = vpack.c.bf16 %v1876_v51, %v1876_v51 }
 0x419   : > { %2205 = vmatpush.bf16.msrb.mxu1 %v1985_v31 }
 0x41a   : > { %vm1853_vm15 = vcmp.ge.f32.partialorder %v1639_v27, 0.0  ;;  %v1861_v26 = vmul.f32 0.2, %v1639_v27 }
 0x41b   : > { %v1367_v35 = vpop.permute.xlu0 %1366 }
 0x41c   : > { %v1869_v38 = vsel %vm1853_vm15, %v1639_v27, %v1861_v26  ;;  %v1480_v49 = vadd.f32 %v5193_v6, %v1367_v35  ;;  %2061 = vmatpush.bf16.msra.mxu0 %v5427_v52  ;;  %4154 = vmatpush.bf16.msrb.mxu2 %v5427_v52  ;;  %v1957_v6 = vunpack.c.l.b16 %v1916_v23 }
 0x41d   : > { %v1877_v19 = vsel %vm981_vm0, %v1869_v38, 0.0  ;;  %2206 = vmatpush.bf16.msrb.mxu1 %v5427_v52 }
 0x41e   : > { %v4039_v53 = vpack.c.bf16 %v1877_v19, %v1876_v51  ;;  %v1586_v8 = vadd.f32 %v5221_v63, %v1480_v49  ;;  %v1917_v55 = vpack.c.bf16 %v1877_v19, %v1877_v19 }
 0x420   : > { %4127 = vst [vmem:[%s5365_s19 + $0x10] sm:$0xff] %v4039_v53   ;;  %v1634_v56 = vadd.f32 %v5447_v14, %v1586_v8  ;;  %v1958_v4 = vunpack.c.l.b16 %v1917_v55  ;;  %v3997_v14 = vld [vmem:[%s5895_s5 + $0x38] sm:$0xff] }
 0x422   : > { %vm1848_vm2 = vcmp.ge.f32.partialorder %v1634_v56, 0.0  ;;  %v1856_v17 = vmul.f32 0.2, %v1634_v56  ;;  %v1963_v24 = vpack.c.b16 %v1958_v4, %v1957_v6 }
 0x424   : > { %v1864_v29 = vsel %vm1848_vm2, %v1634_v56, %v1856_v17  ;;  %2062 = vmatpush.bf16.msra.mxu0 %v1963_v24  ;;  %4155 = vmatpush.bf16.msrb.mxu2 %v1963_v24 }
 0x425   : > { %v1872_v63 = vsel %vm981_vm0, %v1864_v29, 0.0  ;;  %2207 = vmatpush.bf16.msrb.mxu1 %v1963_v24  ;;  %v5610_v29 = vpop.permute.xlu0 %2538 }
 0x426   : > { %v4029_v18 = vpack.c.bf16 %v1873_v15, %v1872_v63  ;;  %v1912_v41 = vpack.c.bf16 %v1872_v63, %v1872_v63  ;;  %v2450_v15 = vld [vmem:[%s5898_s8 + $0x28] sm:$0xff] }
 0x428   : > { %4030 = vst [vmem:[%s5365_s19] sm:$0xff] %v4029_v18   ;;  %2063 = vmatpush.bf16.msra.mxu0 %v5462_v47  ;;  %4156 = vmatpush.bf16.msrb.mxu2 %v5462_v47  ;;  %v1953_v54 = vunpack.c.l.b16 %v1912_v41  ;;  %v5617_v18 = vpop.permute.xlu2 %2533 }
 0x429   : > { %2208 = vmatpush.bf16.msrb.mxu1 %v5462_v47 }
 0x42a   : > { %v1961_v3 = vpack.c.b16 %v1954_v30, %v1953_v54  ;;  %v2448_v54 = vld [vmem:[%s5898_s8 + $0x18] sm:$0xff] }
 0x42c   : > { %2064 = vmatpush.bf16.msra.mxu0 %v1961_v3  ;;  %4157 = vmatpush.bf16.msrb.mxu2 %v1961_v3 }
 0x42d   : > { %2209 = vmatpush.bf16.msrb.mxu1 %v1961_v3  ;;  %v5622_v30 = vpop.permute.xlu0 %2528 }
 0x42f   : > { %2065 = vmatmul.bf16.vlgmr.msra.gmra.mxu0 %v3990_v42  ;;  %2100 = vmatmul.bf16.vlgmr.msrb.gmra.mxu2 %v3997_v14 }
 0x430   : > { %2352 = vmatpush.bf16.msra.mxu2 %v5427_v52  ;;  %2210 = vmatmul.bf16.vlgmr.msrb.gmra.mxu1 %v3998_v60  ;;  %v3992_v52 = vld [vmem:[%s5895_s5 + $0x10] sm:$0xff]  ;;  %v5627_v42 = vpop.permute.xlu2 %2523  ;;  %v2445_v60 = vld [vmem:[%s5898_s8] sm:$0xff] }
 0x434   : > { %2353 = vmatpush.bf16.msra.mxu2 %v1963_v24 }
 0x438   : > { %2354 = vmatpush.bf16.msra.mxu2 %v5462_v47  ;;  %v4005_v47 = vld [vmem:[%s5896_s6 + $0x38] sm:$0xff] }
 0x43c   : > { %2355 = vmatpush.bf16.msra.mxu2 %v1961_v3 }
 0x43f   : > { %2070 = vmatmul.bf16.gmra.mxu0 %v3991_v16  ;;  %3855 = vmatmul.msk.bf16.vlgmr.msra.gmra.mxu2 %vm2323_vm3, %v4006_v46  ;;  %v5633_v16 = vpop.permute.xlu0 %2518 }
 0x440   : > { %2215 = vmatmul.bf16.gmra.mxu1 %v3999_v57 }
 0x44f   : > { %2075 = vmatmul.bf16.gmra.mxu0 %v3992_v52  ;;  %3856 = vmatmul.msk.bf16.gmra.mxu2 %vm2323_vm3, %v4007_v0  ;;  %v2934_v52 = vld [vmem:[%s5900_s10] sm:$0xff]  ;;  %v5638_v0 = vpop.permute.xlu2 %2513 }
 0x450   : > { %2220 = vmatmul.bf16.gmra.mxu1 %v4000_v5  ;;  %v5641_v5 = vpop.permute.xlu0 %2508 }
 0x45f   : > { %2080 = vmatmul.bf16.gmra.mxu0 %v3993_v10  ;;  %3857 = vmatmul.msk.bf16.gmra.mxu2 %vm2323_vm3, %v4008_v33  ;;  %v2937_v33 = vld [vmem:[%s5900_s10 + $0x18] sm:$0xff] }
 0x460   : > { %2225 = vmatmul.bf16.gmra.mxu1 %v4001_v2 }
 0x46f   : > { %2085 = vmatmul.bf16.gmra.mxu0 %v3994_v45  ;;  %3858 = vmatmul.msk.bf16.gmra.mxu2 %vm2323_vm3, %v4009_v58  ;;  %v5649_v45 = vpop.permute.xlu2 %2503 }
 0x470   : > { %2230 = vmatmul.bf16.gmra.mxu1 %v4002_v48  ;;  %v2449_v48 = vld [vmem:[%s5898_s8 + $0x20] sm:$0xff] }
 0x47f   : > { %2090 = vmatmul.bf16.gmra.mxu0 %v3995_v12  ;;  %3859 = vmatmul.msk.bf16.gmra.mxu2 %vm2323_vm3, %v4010_v32  ;;  %v2499_v12 = vpop.permute.xlu0 %2498 }
 0x480   : > { %2235 = vmatmul.bf16.gmra.mxu1 %v4003_v40  ;;  %v2494_v40 = vpop.permute.xlu2 %2493 }
 0x48f   : > { %2095 = vmatmul.bf16.gmra.mxu0 %v3996_v22  ;;  %3860 = vmatmul.msk.bf16.gmra.mxu2 %vm2323_vm3, %v4011_v43 }
 0x490   : > { %2240 = vmatmul.bf16.gmra.mxu1 %v4004_v50 }
 0x49f   : > { %3861 = vmatmul.msk.bf16.gmra.mxu2 %vm2323_vm3, %v4012_v7 }
 0x4a0   : > { %2245 = vmatmul.bf16.gmra.mxu1 %v4005_v47 }
 0x4ac   : > { %v2066_v62 = vpop.f32.mrf.mxu0 }
 0x4ad   : > { %v5596_v9 = vpop.f32.mrf.mxu1 }
 0x4af   : > { %3862 = vmatmul.msk.bf16.gmra.mxu2 %vm2323_vm3, %v4013_v1  ;;  %v2447_v1 = vld [vmem:[%s5898_s8 + $0x10] sm:$0xff] }
 0x4b2   : > { %v2101_v59 = vpop.f32.mrf.mxu2 }
 0x4b3   : > { %2134 = vrot.lane.b32.xlu2 %v2101_v59, %s4182_s15 }
 0x4b4   : > { %v5572_v37 = vpop.f32.mrf.mxu0 }
 0x4b5   : > { %v5599_v55 = vpop.f32.mrf.mxu1 }
 0x4ba   : > { %v2103_v34 = vpop.f32.mrf.mxu2 }
 0x4bb   : > { %2136 = vrot.lane.b32.xlu0 %v2103_v34, %s4182_s15 }
 0x4bc   : > { %v2071_v13 = vpop.f32.mrf.mxu0 }
 0x4bd   : > { %v5608_v17 = vpop.f32.mrf.mxu1 }
 0x4c2   : > { %v5575_v39 = vpop.f32.mrf.mxu2 }
 0x4c3   : > { %2110 = vrot.lane.b32.xlu0 %v2071_v13, %s4182_s15  ;;  %v2935_v13 = vld [vmem:[%s5900_s10 + $0x8] sm:$0xff] }
 0x4c4   : > { %v2073_v61 = vpop.f32.mrf.mxu0 }
 0x4c5   : > { %2112 = vrot.lane.b32.xlu1 %v2073_v61, %s4182_s15  ;;  %v5615_v63 = vpop.f32.mrf.mxu1 }
 0x4ca   : > { %v5579_v28 = vpop.f32.mrf.mxu2 }
 0x4cc   : > { %v2076_v20 = vpop.f32.mrf.mxu0 }
 0x4cd   : > { %2114 = vrot.lane.b32.xlu0 %v2076_v20, %s4182_s15  ;;  %v5625_v3 = vpop.f32.mrf.mxu1 }
 0x4d2   : > { %v5582_v11 = vpop.f32.mrf.mxu2 }
 0x4d4   : > { %v2078_v25 = vpop.f32.mrf.mxu0 }
 0x4d5   : > { %2116 = vrot.lane.b32.xlu1 %v2078_v25, %s4182_s15  ;;  %v2223_v46 = vpop.f32.mrf.mxu1 }
 0x4da   : > { %v5585_v31 = vpop.f32.mrf.mxu2 }
 0x4dc   : > { %v2081_v27 = vpop.f32.mrf.mxu0 }
 0x4dd   : > { %2118 = vrot.lane.b32.xlu0 %v2081_v27, %s4182_s15  ;;  %v2226_v2 = vpop.f32.mrf.mxu1  ;;  %v2936_v27 = vld [vmem:[%s5900_s10 + $0x10] sm:$0xff] }
 0x4e2   : > { %v2367_v51 = vpop.f32.mrf.mxu2 }
 0x4e3   : > { %2405 = vrot.lane.b32.xlu1 %v2367_v51, %s4181_s28  ;;  %v2938_v51 = vld [vmem:[%s5900_s10 + $0x20] sm:$0xff] }
 0x4e4   : > { %v2083_v36 = vpop.f32.mrf.mxu0 }
 0x4e5   : > { %v2228_v32 = vpop.f32.mrf.mxu1 }
 0x4ea   : > { %v2369_v26 = vpop.f32.mrf.mxu2 }
 0x4eb   : > { %2407 = vrot.lane.b32.xlu2 %v2369_v26, %s4181_s28  ;;  %2120 = vrot.lane.b32.xlu1 %v2083_v36, %s4182_s15 }
 0x4ec   : > { %v2086_v35 = vpop.f32.mrf.mxu0 }
 0x4ed   : > { %2122 = vrot.lane.b32.xlu0 %v2086_v35, %s4182_s15  ;;  %v2231_v47 = vpop.f32.mrf.mxu1 }
 0x4f2   : > { %v2372_v38 = vpop.f32.mrf.mxu2 }
 0x4f3   : > { %2409 = vrot.lane.b32.xlu1 %v2372_v38, %s4181_s28 }
 0x4f4   : > { %v2088_v49 = vpop.f32.mrf.mxu0 }
 0x4f5   : > { %v2233_v61 = vpop.f32.mrf.mxu1 }
 0x4fa   : > { %v2374_v23 = vpop.f32.mrf.mxu2 }
 0x4fb   : > { %2411 = vrot.lane.b32.xlu2 %v2374_v23, %s4181_s28  ;;  %2124 = vrot.lane.b32.xlu1 %v2088_v49, %s4182_s15 }
 0x4fc   : > { %v2091_v19 = vpop.f32.mrf.mxu0 }
 0x4fd   : > { %2126 = vrot.lane.b32.xlu0 %v2091_v19, %s4182_s15  ;;  %v2236_v35 = vpop.f32.mrf.mxu1 }
 0x502   : > { %v2377_v53 = vpop.f32.mrf.mxu2 }
 0x503   : > { %2413 = vrot.lane.b32.xlu1 %v2377_v53, %s4181_s28 }
 0x504   : > { %v2093_v8 = vpop.f32.mrf.mxu0 }
 0x50a   : > { %v2379_v56 = vpop.f32.mrf.mxu2 }
 0x50b   : > { %2415 = vrot.lane.b32.xlu2 %v2379_v56, %s4181_s28  ;;  %2128 = vrot.lane.b32.xlu1 %v2093_v8, %s4182_s15 }
 0x50c   : > { %v2096_v6 = vpop.f32.mrf.mxu0 }
 0x50d   : > { %2130 = vrot.lane.b32.xlu0 %v2096_v6, %s4182_s15  ;;  %v5666_v7 = vpop.permute.xlu2 %2134 }
 0x512   : > { %v2382_v4 = vpop.f32.mrf.mxu2 }
 0x513   : > { %2417 = vrot.lane.b32.xlu1 %v2382_v4, %s4181_s28 }
 0x514   : > { %v2098_v24 = vpop.f32.mrf.mxu0 }
 0x515   : > { %2488 = vperm.xlu0 %4169, %v2450_v15  }
 0x51a   : > { %v2384_v21 = vpop.f32.mrf.mxu2 }
 0x51b   : > { %2419 = vrot.lane.b32.xlu2 %v2384_v21, %s4181_s28  ;;  %2132 = vrot.lane.b32.xlu1 %v2098_v24, %s4182_s15  ;;  %v2238_v21 = vpop.f32.mrf.mxu1 }
 0x51d   : > { %2106 = vrot.lane.b32.xlu0 %v2066_v62, %s4182_s15  ;;  %v2446_v62 = vld [vmem:[%s5898_s8 + $0x8] sm:$0xff] }
 0x522   : > { %v2387_v41 = vpop.f32.mrf.mxu2 }
 0x523   : > { %2421 = vrot.lane.b32.xlu1 %v2387_v41, %s4181_s28 }
 0x525   : > { %2478 = vperm.xlu0 %4169, %v2448_v54  }
 0x52a   : > { %v2389_v14 = vpop.f32.mrf.mxu2 }
 0x52b   : > { %2423 = vrot.lane.b32.xlu2 %v2389_v14, %s4181_s28 }
 0x52d   : > { %2463 = vperm.xlu0 %4169, %v2445_v60   ;;  %v5660_v50 = vpop.permute.xlu0 %2136 }
 0x532   : > { %v2392_v57 = vpop.f32.mrf.mxu2 }
 0x533   : > { %2425 = vrot.lane.b32.xlu1 %v2392_v57, %s4181_s28 }
 0x535   : > { %2944 = vperm.xlu0 %4169, %v2934_v52   ;;  %v5674_v59 = vpop.permute.xlu0 %2110 }
 0x537   : > { %v5651_v58 = vpop.permute.xlu1 %2112 }
 0x53a   : > { %v2394_v10 = vpop.f32.mrf.mxu2 }
 0x53b   : > { %2427 = vrot.lane.b32.xlu2 %v2394_v10, %s4181_s28  ;;  %2401 = vrot.lane.b32.xlu1 %v5582_v11, %s4181_s28 }
 0x53d   : > { %2959 = vperm.xlu0 %4169, %v2937_v33  }
 0x543   : > { %2483 = vperm.xlu2 %4171, %v2449_v48   ;;  %2108 = vrot.lane.b32.xlu1 %v5572_v37, %s4182_s15 }
 0x545   : > { %v5678_v34 = vpop.permute.xlu2 %2407 }
 0x547   : > { %v2117_v22 = vpop.permute.xlu1 %2116 }
 0x548   : > { %v5658_v43 = vadd.f32 %v2223_v46, %v2117_v22  ;;  %v2241_v22 = vpop.f32.mrf.mxu1 }
 0x54b   : > { %2403 = vrot.lane.b32.xlu2 %v5585_v31, %s4181_s28  ;;  %2397 = vrot.lane.b32.xlu1 %v5575_v39, %s4181_s28  ;;  %v5683_v39 = vpop.permute.xlu0 %2114 }
 0x553   : > { %2473 = vperm.xlu2 %4171, %v2447_v1   ;;  %2468 = vperm.xlu1 %4170, %v2446_v62   ;;  %v2119_v36 = vpop.permute.xlu0 %2118 }
 0x555   : > { %v5676_v37 = vpop.permute.xlu1 %2405  ;;  %v2412_v25 = vpop.permute.xlu2 %2411 }
 0x55b   : > { %2399 = vrot.lane.b32.xlu2 %v5579_v28, %s4181_s28  ;;  %2949 = vperm.xlu1 %4170, %v2935_v13   ;;  %v2257_v28 = vadd.f32 %v2226_v2, %v2119_v36 }
 0x55d   : > { %v2121_v20 = vpop.permute.xlu1 %2120 }
 0x55e   : > { %v2258_v11 = vadd.f32 %v2228_v32, %v2121_v20 }
 0x55f   : > { %v2123_v10 = vpop.permute.xlu0 %2122 }
 0x560   : > { %v2436_v31 = vadd.f32 %v2412_v25, %v2258_v11  ;;  %v2259_v48 = vadd.f32 %v2231_v47, %v2123_v10 }
 0x562   : > { %v2548_v26 = vadd.f32 %v2499_v12, %v2436_v31 }
 0x563   : > { %2954 = vperm.xlu2 %4171, %v2936_v27   ;;  %2964 = vperm.xlu1 %4170, %v2938_v51   ;;  %v2243_v51 = vpop.f32.mrf.mxu1 }
 0x564   : > { %vm2564_vm4 = vcmp.ge.f32.partialorder %v2548_v26, 0.0  ;;  %v2580_v38 = vmul.f32 0.2, %v2548_v26 }
 0x565   : > { %v2410_v49 = vpop.permute.xlu1 %2409  ;;  %v2416_v60 = vpop.permute.xlu2 %2415 }
 0x566   : > { %v2435_v23 = vadd.f32 %v2410_v49, %v2257_v28  ;;  %v2596_v19 = vsel %vm2564_vm4, %v2548_v26, %v2580_v38 }
 0x567   : > { %v2612_v8 = vsel %vm981_vm0, %v2596_v19, 0.0 }
 0x568   : > { %v2547_v53 = vadd.f32 %v2494_v40, %v2435_v23  ;;  %v2628_v4 = vpack.c.bf16 %v2612_v8, %v2612_v8 }
 0x56a   : > { %vm2563_vm5 = vcmp.ge.f32.partialorder %v2547_v53, 0.0  ;;  %v2579_v56 = vmul.f32 0.2, %v2547_v53  ;;  %v2708_v52 = vunpack.c.l.b16 %v2628_v4 }
 0x56c   : > { %v2595_v6 = vsel %vm2563_vm5, %v2547_v53, %v2579_v56  ;;  %v2246_v56 = vpop.f32.mrf.mxu1 }
 0x56d   : > { %v2125_v15 = vpop.permute.xlu1 %2124  ;;  %v2611_v24 = vsel %vm981_vm0, %v2595_v6, 0.0 }
 0x56e   : > { %v2260_v41 = vadd.f32 %v2233_v61, %v2125_v15  ;;  %v2627_v54 = vpack.c.bf16 %v2611_v24, %v2611_v24  ;;  %v4084_v14 = vpack.c.bf16 %v2612_v8, %v2611_v24 }
 0x56f   : > { %v2127_v20 = vpop.permute.xlu0 %2126 }
 0x570   : > { %v2438_v46 = vadd.f32 %v2416_v60, %v2260_v41  ;;  %4135 = vst [vmem:[%s5700_s24 + $0x18] sm:$0xff] %v4084_v14   ;;  %v2707_v57 = vunpack.c.l.b16 %v2627_v54  ;;  %v2261_v26 = vadd.f32 %v2236_v35, %v2127_v20  ;;  %v2434_v54 = vadd.f32 %v5678_v34, %v5658_v43 }
 0x572   : > { %v2550_v33 = vadd.f32 %v5641_v5, %v2438_v46  ;;  %v5706_v2 = vpack.c.b16 %v2708_v52, %v2707_v57 }
 0x574   : > { %v2582_v32 = vmul.f32 0.2, %v2550_v33  ;;  %vm2566_vm6 = vcmp.ge.f32.partialorder %v2550_v33, 0.0  ;;  %v2248_v46 = vpop.f32.mrf.mxu1 }
 0x575   : > { %v2414_v12 = vpop.permute.xlu1 %2413  ;;  %v2420_v27 = vpop.permute.xlu2 %2419 }
 0x576   : > { %v2437_v40 = vadd.f32 %v2414_v12, %v2259_v48  ;;  %v2598_v13 = vsel %vm2566_vm6, %v2550_v33, %v2582_v32  ;;  %v2266_v32 = vadd.f32 %v2248_v46, %v5660_v50 }
 0x577   : > { %v5715_v47 = vsel %vm981_vm0, %v2598_v13, 0.0 }
 0x578   : > { %v2549_v1 = vadd.f32 %v5649_v45, %v2437_v40 }
 0x57a   : > { %vm2565_vm7 = vcmp.ge.f32.partialorder %v2549_v1, 0.0  ;;  %v2581_v62 = vmul.f32 0.2, %v2549_v1 }
 0x57c   : > { %v2597_v61 = vsel %vm2565_vm7, %v2549_v1, %v2581_v62  ;;  %v2255_v1 = vadd.f32 %v5625_v3, %v5683_v39 }
 0x57d   : > { %v2129_v11 = vpop.permute.xlu1 %2128  ;;  %v5711_v5 = vsel %vm981_vm0, %v2597_v61, 0.0 }
 0x57e   : > { %v2262_v25 = vadd.f32 %v2238_v21, %v2129_v11  ;;  %v4089_v31 = vpack.c.bf16 %v5715_v47, %v5711_v5  ;;  %v2433_v62 = vadd.f32 %v5676_v37, %v2255_v1 }
 0x57f   : > { %v2131_v49 = vpop.permute.xlu0 %2130 }
 0x580   : > { %v2440_v45 = vadd.f32 %v2420_v27, %v2262_v25  ;;  %4136 = vst [vmem:[%s5700_s24 + $0x20] sm:$0xff] %v4089_v31   ;;  %v2263_v57 = vadd.f32 %v2241_v22, %v2131_v49 }
 0x582   : > { %v2552_v36 = vadd.f32 %v5633_v16, %v2440_v45 }
 0x584   : > { %v2584_v38 = vmul.f32 0.2, %v2552_v36  ;;  %vm2568_vm8 = vcmp.ge.f32.partialorder %v2552_v36, 0.0 }
 0x585   : > { %v2418_v28 = vpop.permute.xlu1 %2417  ;;  %v2424_v4 = vpop.permute.xlu2 %2423 }
 0x586   : > { %v2439_v23 = vadd.f32 %v2418_v28, %v2261_v26  ;;  %v2600_v8 = vsel %vm2568_vm8, %v2552_v36, %v2584_v38  ;;  %v2265_v36 = vadd.f32 %v2246_v56, %v5666_v7  ;;  %v2254_v26 = vadd.f32 %v5615_v63, %v5651_v58 }
 0x587   : > { %v5728_v16 = vsel %vm981_vm0, %v2600_v8, 0.0  ;;  %v2253_v56 = vadd.f32 %v5608_v17, %v5674_v59 }
 0x588   : > { %v2551_v19 = vadd.f32 %v5638_v0, %v2439_v23  ;;  %v2489_v0 = vpop.permute.xlu0 %2488 }
 0x589   : > { %v2546_v60 = vadd.f32 %v2489_v0, %v2434_v54 }
 0x58a   : > { %vm2567_vm9 = vcmp.ge.f32.partialorder %v2551_v19, 0.0  ;;  %v2583_v53 = vmul.f32 0.2, %v2551_v19 }
 0x58b   : > { %v2578_v12 = vmul.f32 0.2, %v2546_v60  ;;  %vm2562_vm11 = vcmp.ge.f32.partialorder %v2546_v60, 0.0 }
 0x58c   : > { %v2599_v6 = vsel %vm2567_vm9, %v2551_v19, %v2583_v53 }
 0x58d   : > { %v2133_v15 = vpop.permute.xlu1 %2132  ;;  %v5724_v24 = vsel %vm981_vm0, %v2599_v6, 0.0  ;;  %v2594_v22 = vsel %vm2562_vm11, %v2546_v60, %v2578_v12 }
 0x58e   : > { %v2264_v35 = vadd.f32 %v2243_v51, %v2133_v15  ;;  %v4094_v21 = vpack.c.bf16 %v5728_v16, %v5724_v24  ;;  %v2610_v3 = vsel %vm981_vm0, %v2594_v22, 0.0  ;;  %v2631_v17 = vpack.c.bf16 %v5724_v24, %v5724_v24 }
 0x58f   : > { %v2626_v31 = vpack.c.bf16 %v2610_v3, %v2610_v3  ;;  %v2632_v22 = vpack.c.bf16 %v5728_v16, %v5728_v16 }
 0x590   : > { %v2442_v41 = vadd.f32 %v2424_v4, %v2264_v35  ;;  %4137 = vst [vmem:[%s5700_s24 + $0x28] sm:$0xff] %v4094_v21   ;;  %v5741_v61 = vpop.permute.xlu0 %2106 }
 0x591   : > { %v2706_v23 = vunpack.c.l.b16 %v2626_v31 }
 0x592   : > { %v2554_v14 = vadd.f32 %v5622_v30, %v2442_v41 }
 0x594   : > { %v2586_v33 = vmul.f32 0.2, %v2554_v14  ;;  %vm2570_vm10 = vcmp.ge.f32.partialorder %v2554_v14, 0.0 }
 0x595   : > { %v2428_v52 = vpop.permute.xlu2 %2427  ;;  %v2422_v10 = vpop.permute.xlu1 %2421 }
 0x596   : > { %v2441_v48 = vadd.f32 %v2422_v10, %v2263_v57  ;;  %v2444_v43 = vadd.f32 %v2428_v52, %v2266_v32  ;;  %v2602_v34 = vsel %vm2570_vm10, %v2554_v14, %v2586_v33 }
 0x598   : > { %v2553_v40 = vadd.f32 %v5627_v42, %v2441_v48  ;;  %v2618_v42 = vsel %vm981_vm0, %v2602_v34, 0.0  ;;  %v2556_v39 = vadd.f32 %v5610_v29, %v2444_v43  ;;  %v2479_v4 = vpop.permute.xlu0 %2478 }
 0x599   : > { %v2634_v32 = vpack.c.bf16 %v2618_v42, %v2618_v42 }
 0x59a   : > { %vm2569_vm12 = vcmp.ge.f32.partialorder %v2553_v40, 0.0  ;;  %v2585_v30 = vmul.f32 0.2, %v2553_v40  ;;  %v2588_v27 = vmul.f32 0.2, %v2556_v39  ;;  %vm2572_vm14 = vcmp.ge.f32.partialorder %v2556_v39, 0.0 }
 0x59b   : > { %v2714_v34 = vunpack.c.l.b16 %v2634_v32 }
 0x59c   : > { %v2601_v13 = vsel %vm2569_vm12, %v2553_v40, %v2585_v30  ;;  %v2604_v19 = vsel %vm2572_vm14, %v2556_v39, %v2588_v27 }
 0x59d   : > { %v2484_v20 = vpop.permute.xlu2 %2483  ;;  %v2617_v50 = vsel %vm981_vm0, %v2601_v13, 0.0  ;;  %v2620_v7 = vsel %vm981_vm0, %v2604_v19, 0.0  ;;  %v2629_v13 = vpack.c.bf16 %v5711_v5, %v5711_v5  ;;  %v2251_v5 = vadd.f32 %v5596_v9, %v5741_v61 }
 0x59e   : > { %v2545_v11 = vadd.f32 %v2484_v20, %v2433_v62  ;;  %v4099_v25 = vpack.c.bf16 %v2618_v42, %v2617_v50  ;;  %v2636_v0 = vpack.c.bf16 %v2620_v7, %v2620_v7  ;;  %v2711_v42 = vunpack.c.l.b16 %v2631_v17 }
 0x59f   : > { %v2709_v27 = vunpack.c.l.b16 %v2629_v13 }
 0x5a0   : > { %vm2561_vm13 = vcmp.ge.f32.partialorder %v2545_v11, 0.0  ;;  %v2577_v37 = vmul.f32 0.2, %v2545_v11  ;;  %4138 = vst [vmem:[%s5700_s24 + $0x30] sm:$0xff] %v4099_v25   ;;  %v2716_v12 = vunpack.c.l.b16 %v2636_v0  ;;  %v2630_v25 = vpack.c.bf16 %v5715_v47, %v5715_v47  ;;  %v4014_v0 = vld [vmem:[%s5899_s9] sm:$0xff] }
 0x5a2   : > { %v2593_v45 = vsel %vm2561_vm13, %v2545_v11, %v2577_v37  ;;  %v2712_v11 = vunpack.c.l.b16 %v2632_v22 }
 0x5a3   : > { %v2609_v51 = vsel %vm981_vm0, %v2593_v45, 0.0 }
 0x5a4   : > { %v4079_v28 = vpack.c.bf16 %v2610_v3, %v2609_v51  ;;  %v2625_v29 = vpack.c.bf16 %v2609_v51, %v2609_v51  ;;  %v2722_v31 = vpack.c.b16 %v2712_v11, %v2711_v42  ;;  %v2710_v51 = vunpack.c.l.b16 %v2630_v25  ;;  %v2939_v42 = vld [vmem:[%s5900_s10 + $0x28] sm:$0xff] }
 0x5a5   : > { %v2404_v38 = vpop.permute.xlu2 %2403  ;;  %v2426_v49 = vpop.permute.xlu1 %2425 }
 0x5a6   : > { %4134 = vst [vmem:[%s5700_s24 + $0x10] sm:$0xff] %v4079_v28   ;;  %v2432_v53 = vadd.f32 %v2404_v38, %v2254_v26  ;;  %v2443_v8 = vadd.f32 %v2426_v49, %v2265_v36  ;;  %v2705_v6 = vunpack.c.l.b16 %v2625_v29  ;;  %v2721_v28 = vpack.c.b16 %v2710_v51, %v2709_v27  ;;  %v2464_v29 = vpop.permute.xlu0 %2463 }
 0x5a8   : > { %v2544_v15 = vadd.f32 %v2479_v4, %v2432_v53  ;;  %v2555_v35 = vadd.f32 %v5617_v18, %v2443_v8  ;;  %v5758_v21 = vpack.c.b16 %v2706_v23, %v2705_v6  ;;  %v2633_v18 = vpack.c.bf16 %v2617_v50, %v2617_v50 }
 0x5aa   : > { %v2576_v63 = vmul.f32 0.2, %v2544_v15  ;;  %vm2571_vm15 = vcmp.ge.f32.partialorder %v2555_v35, 0.0  ;;  %v2587_v58 = vmul.f32 0.2, %v2555_v35  ;;  %vm2560_vm1 = vcmp.ge.f32.partialorder %v2544_v15, 0.0 }
 0x5ab   : > { %v2713_v43 = vunpack.c.l.b16 %v2633_v18  ;;  %v4016_v18 = vld [vmem:[%s5899_s9 + $0x10] sm:$0xff] }
 0x5ac   : > { %v2603_v41 = vsel %vm2571_vm15, %v2555_v35, %v2587_v58  ;;  %v2592_v60 = vsel %vm2560_vm1, %v2544_v15, %v2576_v63 }
 0x5ad   : > { %v2619_v54 = vsel %vm981_vm0, %v2603_v41, 0.0  ;;  %v2402_v14 = vpop.permute.xlu1 %2401  ;;  %v2474_v10 = vpop.permute.xlu2 %2473  ;;  %v2608_v59 = vsel %vm981_vm0, %v2592_v60, 0.0  ;;  %v2723_v50 = vpack.c.b16 %v2714_v34, %v2713_v43  ;;  %v4022_v41 = vld [vmem:[%s5899_s9 + $0x40] sm:$0xff]  ;;  %v4024_v60 = vld [vmem:[%s5899_s9 + $0x50] sm:$0xff] }
 0x5ae   : > { %v2635_v46 = vpack.c.bf16 %v2619_v54, %v2619_v54  ;;  %v4104_v57 = vpack.c.bf16 %v2620_v7, %v2619_v54  ;;  %v2431_v52 = vadd.f32 %v2402_v14, %v2253_v56  ;;  %v2624_v62 = vpack.c.bf16 %v2608_v59, %v2608_v59  ;;  %v4015_v54 = vld [vmem:[%s5899_s9 + $0x8] sm:$0xff] }
 0x5af   : > { %v4023_v14 = vld [vmem:[%s5899_s9 + $0x48] sm:$0xff] }
 0x5b0   : > { %4139 = vst [vmem:[%s5700_s24 + $0x38] sm:$0xff] %v4104_v57   ;;  %v2543_v33 = vadd.f32 %v2474_v10, %v2431_v52  ;;  %v2715_v48 = vunpack.c.l.b16 %v2635_v46  ;;  %v2704_v37 = vunpack.c.l.b16 %v2624_v62  ;;  %v4018_v46 = vld [vmem:[%s5899_s9 + $0x20] sm:$0xff]  ;;  %v4019_v57 = vld [vmem:[%s5899_s9 + $0x28] sm:$0xff]  ;;  %v4020_v52 = vld [vmem:[%s5899_s9 + $0x30] sm:$0xff] }
 0x5b1   : > { %v4021_v10 = vld [vmem:[%s5899_s9 + $0x38] sm:$0xff] }
 0x5b2   : > { %vm2559_vm2 = vcmp.ge.f32.partialorder %v2543_v33, 0.0  ;;  %v2575_v40 = vmul.f32 0.2, %v2543_v33  ;;  %v5771_v1 = vpack.c.b16 %v2716_v12, %v2715_v48 }
 0x5b4   : > { %v2591_v30 = vsel %vm2559_vm2, %v2543_v33, %v2575_v40  ;;  %2733 = vmatpush.bf16.msrb.mxu3 %v5771_v1  ;;  %2881 = vmatpush.bf16.msrb.mxu0 %v5771_v1 }
 0x5b5   : > { %v2109_v24 = vpop.permute.xlu1 %2108  ;;  %v2607_v20 = vsel %vm981_vm0, %v2591_v30, 0.0  ;;  %v2400_v23 = vpop.permute.xlu2 %2399 }
 0x5b6   : > { %v2623_v3 = vpack.c.bf16 %v2607_v20, %v2607_v20  ;;  %v4074_v39 = vpack.c.bf16 %v2608_v59, %v2607_v20  ;;  %v2252_v38 = vadd.f32 %v5599_v55, %v2109_v24  ;;  %v2941_v20 = vld [vmem:[%s5900_s10 + $0x38] sm:$0xff] }
 0x5b8   : > { %2734 = vmatpush.bf16.msrb.mxu3 %v2723_v50  ;;  %2882 = vmatpush.bf16.msrb.mxu0 %v2723_v50  ;;  %4133 = vst [vmem:[%s5700_s24 + $0x8] sm:$0xff] %v4074_v39   ;;  %v2703_v16 = vunpack.c.l.b16 %v2623_v3  ;;  %v2430_v9 = vadd.f32 %v2400_v23, %v2252_v38  ;;  %v2940_v3 = vld [vmem:[%s5900_s10 + $0x30] sm:$0xff] }
 0x5ba   : > { %v2718_v45 = vpack.c.b16 %v2704_v37, %v2703_v16  ;;  %v2945_v37 = vpop.permute.xlu0 %2944 }
 0x5bc   : > { %2735 = vmatpush.bf16.msrb.mxu3 %v2722_v31  ;;  %2883 = vmatpush.bf16.msrb.mxu0 %v2722_v31 }
 0x5bd   : > { %v2398_v36 = vpop.permute.xlu1 %2397  ;;  %v2955_v39 = vpop.permute.xlu2 %2954 }
 0x5be   : > { %v2429_v26 = vadd.f32 %v2398_v36, %v2251_v5 }
 0x5c0   : > { %v2541_v49 = vadd.f32 %v2464_v29, %v2429_v26  ;;  %2736 = vmatpush.bf16.msrb.mxu3 %v2721_v28  ;;  %2884 = vmatpush.bf16.msrb.mxu0 %v2721_v28 }
 0x5c2   : > { %vm2557_vm3 = vcmp.ge.f32.partialorder %v2541_v49, 0.0  ;;  %v2573_v47 = vmul.f32 0.2, %v2541_v49  ;;  %v2960_v5 = vpop.permute.xlu0 %2959 }
 0x5c4   : > { %v2589_v19 = vsel %vm2557_vm3, %v2541_v49, %v2573_v47  ;;  %2737 = vmatpush.bf16.msrb.mxu3 %v5706_v2  ;;  %2885 = vmatpush.bf16.msrb.mxu0 %v5706_v2 }
 0x5c5   : > { %v2469_v61 = vpop.permute.xlu1 %2468  ;;  %v2605_v8 = vsel %vm981_vm0, %v2589_v19, 0.0 }
 0x5c6   : > { %v2542_v53 = vadd.f32 %v2469_v61, %v2430_v9  ;;  %v2621_v4 = vpack.c.bf16 %v2605_v8, %v2605_v8 }
 0x5c8   : > { %vm2558_vm4 = vcmp.ge.f32.partialorder %v2542_v53, 0.0  ;;  %v2574_v55 = vmul.f32 0.2, %v2542_v53  ;;  %2738 = vmatpush.bf16.msrb.mxu3 %v5758_v21  ;;  %2886 = vmatpush.bf16.msrb.mxu0 %v5758_v21  ;;  %v2701_v63 = vunpack.c.l.b16 %v2621_v4 }
 0x5ca   : > { %v2590_v6 = vsel %vm2558_vm4, %v2542_v53, %v2574_v55 }
 0x5cb   : > { %v2606_v15 = vsel %vm981_vm0, %v2590_v6, 0.0 }
 0x5cc   : > { %v4069_v35 = vpack.c.bf16 %v2606_v15, %v2605_v8  ;;  %2739 = vmatpush.bf16.msrb.mxu3 %v2718_v45  ;;  %2887 = vmatpush.bf16.msrb.mxu0 %v2718_v45  ;;  %v2622_v7 = vpack.c.bf16 %v2606_v15, %v2606_v15 }
 0x5cd   : > { %v2950_v11 = vpop.permute.xlu1 %2949 }
 0x5ce   : > { %4070 = vst [vmem:[%s5700_s24] sm:$0xff] %v4069_v35   ;;  %v2702_v58 = vunpack.c.l.b16 %v2622_v7 }
 0x5d0   : > { %v2717_v56 = vpack.c.b16 %v2702_v58, %v2701_v63 }
 0x5d2   : > { %2740 = vmatpush.bf16.msrb.mxu3 %v2717_v56  ;;  %2888 = vmatpush.bf16.msrb.mxu0 %v2717_v56 }
 0x5d5   : > { %2741 = vmatmul.bf16.vlgmr.msrb.gmra.mxu3 %v4014_v0  ;;  %2889 = vmatmul.bf16.vlgmr.msrb.gmra.mxu0 %v4022_v41 }
 0x5d6   : > { %2811 = vmatpush.bf16.msra.mxu3 %v5771_v1 }
 0x5da   : > { %2812 = vmatpush.bf16.msra.mxu3 %v2723_v50 }
 0x5de   : > { %2813 = vmatpush.bf16.msra.mxu3 %v2722_v31  ;;  %v2965_v31 = vpop.permute.xlu1 %2964 }
 0x5e2   : > { %2814 = vmatpush.bf16.msra.mxu3 %v2721_v28 }
 0x5e5   : > { %2746 = vmatmul.bf16.gmra.mxu3 %v4015_v54  ;;  %2894 = vmatmul.bf16.gmra.mxu0 %v4023_v14 }
 0x5e6   : > { %2815 = vmatpush.bf16.msra.mxu3 %v5706_v2  ;;  %v4017_v2 = vld [vmem:[%s5899_s9 + $0x18] sm:$0xff] }
 0x5ea   : > { %2816 = vmatpush.bf16.msra.mxu3 %v5758_v21  ;;  %v4025_v21 = vld [vmem:[%s5899_s9 + $0x58] sm:$0xff] }
 0x5ee   : > { %2817 = vmatpush.bf16.msra.mxu3 %v2718_v45 }
 0x5f2   : > { %2818 = vmatpush.bf16.msra.mxu3 %v2717_v56 }
 0x5f5   : > { %2751 = vmatmul.bf16.gmra.mxu3 %v4016_v18  ;;  %2899 = vmatmul.bf16.gmra.mxu0 %v4024_v60 }
 0x605   : > { %2756 = vmatmul.bf16.gmra.mxu3 %v4017_v2  ;;  %2904 = vmatmul.bf16.gmra.mxu0 %v4025_v21 }
 0x615   : > { %2819 = vmatmul.bf16.vlgmr.msra.gmra.mxu3 %v4018_v46 }
 0x625   : > { %2824 = vmatmul.bf16.gmra.mxu3 %v4019_v57 }
 0x635   : > { %2829 = vmatmul.bf16.gmra.mxu3 %v4020_v52 }
 0x645   : > { %2834 = vmatmul.bf16.gmra.mxu3 %v4021_v10 }
 0x652   : > { %v2890_v33 = vpop.f32.mrf.mxu0 }
 0x653   : > { %2910 = vrot.lane.b32.xlu1 %v2890_v33, %s4181_s28 }
 0x658   : > { %v2742_v48 = vpop.f32.mrf.mxu3 }
 0x659   : > { %2762 = vrot.lane.b32.xlu2 %v2742_v48, %s4182_s15 }
 0x65a   : > { %v2892_v12 = vpop.f32.mrf.mxu0 }
 0x660   : > { %v2744_v32 = vpop.f32.mrf.mxu3 }
 0x661   : > { %2764 = vrot.lane.b32.xlu0 %v2744_v32, %s4182_s15  ;;  %2912 = vrot.lane.b32.xlu2 %v2892_v12, %s4181_s28 }
 0x662   : > { %v2895_v17 = vpop.f32.mrf.mxu0 }
 0x668   : > { %v2747_v59 = vpop.f32.mrf.mxu3 }
 0x669   : > { %2766 = vrot.lane.b32.xlu1 %v2747_v59, %s4182_s15  ;;  %2914 = vrot.lane.b32.xlu0 %v2895_v17, %s4181_s28 }
 0x66a   : > { %v2897_v40 = vpop.f32.mrf.mxu0 }
 0x670   : > { %v2749_v1 = vpop.f32.mrf.mxu3 }
 0x671   : > { %2916 = vrot.lane.b32.xlu1 %v2897_v40, %s4181_s28  ;;  %2768 = vrot.lane.b32.xlu2 %v2749_v1, %s4182_s15 }
 0x672   : > { %v2900_v43 = vpop.f32.mrf.mxu0 }
 0x678   : > { %v2752_v30 = vpop.f32.mrf.mxu3 }
 0x679   : > { %2770 = vrot.lane.b32.xlu0 %v2752_v30, %s4182_s15  ;;  %2918 = vrot.lane.b32.xlu2 %v2900_v43, %s4181_s28 }
 0x67a   : > { %v2902_v34 = vpop.f32.mrf.mxu0 }
 0x680   : > { %v2754_v22 = vpop.f32.mrf.mxu3 }
 0x681   : > { %2772 = vrot.lane.b32.xlu1 %v2754_v22, %s4182_s15  ;;  %2920 = vrot.lane.b32.xlu0 %v2902_v34, %s4181_s28 }
 0x682   : > { %v2905_v62 = vpop.f32.mrf.mxu0 }
 0x688   : > { %v2757_v24 = vpop.f32.mrf.mxu3 }
 0x689   : > { %2922 = vrot.lane.b32.xlu1 %v2905_v62, %s4181_s28  ;;  %2774 = vrot.lane.b32.xlu2 %v2757_v24, %s4182_s15 }
 0x68a   : > { %v2907_v13 = vpop.f32.mrf.mxu0 }
 0x690   : > { %v2759_v50 = vpop.f32.mrf.mxu3 }
 0x691   : > { %2979 = vperm.xlu1 %4170, %v2941_v20   ;;  %2924 = vrot.lane.b32.xlu2 %v2907_v13, %s4181_s28  ;;  %s3932_s28 = sshll.u32 %s5921_s30, 4 }
 0x692   : > { %2776 = vrot.lane.b32.xlu0 %v2759_v50, %s4182_s15  ;;  %s499_s22 = scalar_lea.vmem %s5903_s13, %s3932_s28  ;;  %s504_s26 = scalar_lea.vmem %s5904_s14, %s3932_s28 }
 0x698   : > { %v2820_v16 = vpop.f32.mrf.mxu3 }
 0x699   : > { %2969 = vperm.xlu2 %4171, %v2939_v42  }
 0x69a   : > { %2974 = vperm.xlu0 %4169, %v2940_v3  }
 0x6a0   : > { %v2822_v45 = vpop.f32.mrf.mxu3 }
 0x6a8   : > { %v2825_v47 = vpop.f32.mrf.mxu3 }
 0x6b0   : > { %v2827_v56 = vpop.f32.mrf.mxu3 }
 0x6b3   : > { %v2763_v25 = vpop.permute.xlu2 %2762 }
 0x6b4   : > { %v2840_v36 = vadd.f32 %v2820_v16, %v2763_v25 }
 0x6b8   : > { %v2830_v57 = vpop.f32.mrf.mxu3 }
 0x6bb   : > { %v2913_v27 = vpop.permute.xlu2 %2912 }
 0x6c0   : > { %v2832_v1 = vpop.f32.mrf.mxu3 }
 0x6c5   : > { %v2911_v51 = vpop.permute.xlu1 %2910 }
 0x6c6   : > { %v2926_v26 = vadd.f32 %v2911_v51, %v2840_v36 }
 0x6c8   : > { %v2982_v29 = vadd.f32 %v2945_v37, %v2926_v26  ;;  %v2835_v3 = vpop.f32.mrf.mxu3 }
 0x6ca   : > { %v2998_v23 = vmul.f32 0.2, %v2982_v29  ;;  %vm2990_vm5 = vcmp.ge.f32.partialorder %v2982_v29, 0.0 }
 0x6cb   : > { %v2769_v28 = vpop.permute.xlu2 %2768 }
 0x6cc   : > { %v3006_v53 = vsel %vm2990_vm5, %v2982_v29, %v2998_v23  ;;  %v2843_v41 = vadd.f32 %v2827_v56, %v2769_v28 }
 0x6cd   : > { %v3014_v35 = vsel %vm981_vm0, %v3006_v53, 0.0 }
 0x6d3   : > { %v2765_v38 = vpop.permute.xlu0 %2764  ;;  %v2919_v61 = vpop.permute.xlu2 %2918 }
 0x6d4   : > { %v2841_v49 = vadd.f32 %v2822_v45, %v2765_v38 }
 0x6d6   : > { %v2927_v19 = vadd.f32 %v2913_v27, %v2841_v49 }
 0x6d8   : > { %v2983_v9 = vadd.f32 %v2950_v11, %v2927_v19 }
 0x6da   : > { %vm2991_vm6 = vcmp.ge.f32.partialorder %v2983_v9, 0.0  ;;  %v2999_v8 = vmul.f32 0.2, %v2983_v9 }
 0x6db   : > { %v2767_v55 = vpop.permute.xlu1 %2766  ;;  %v2915_v6 = vpop.permute.xlu0 %2914 }
 0x6dc   : > { %v3007_v4 = vsel %vm2991_vm6, %v2983_v9, %v2999_v8  ;;  %v2842_v15 = vadd.f32 %v2825_v47, %v2767_v55 }
 0x6dd   : > { %v3015_v7 = vsel %vm981_vm0, %v3007_v4, 0.0 }
 0x6de   : > { %v4109_v63 = vpack.c.bf16 %v3015_v7, %v3014_v35  ;;  %v2928_v58 = vadd.f32 %v2915_v6, %v2842_v15 }
 0x6e0   : > { %v2984_v0 = vadd.f32 %v2955_v39, %v2928_v58  ;;  %4110 = vst [vmem:[%s499_s22] sm:$0xff] %v4109_v63  }
 0x6e2   : > { %v3000_v18 = vmul.f32 0.2, %v2984_v0  ;;  %vm2992_vm7 = vcmp.ge.f32.partialorder %v2984_v0, 0.0 }
 0x6e3   : > { %v2775_v54 = vpop.permute.xlu2 %2774  ;;  %v2917_v14 = vpop.permute.xlu1 %2916 }
 0x6e4   : > { %v2929_v60 = vadd.f32 %v2917_v14, %v2843_v41  ;;  %v3008_v21 = vsel %vm2992_vm7, %v2984_v0, %v3000_v18  ;;  %v2846_v51 = vadd.f32 %v2835_v3, %v2775_v54 }
 0x6e5   : > { %v3016_v10 = vsel %vm981_vm0, %v3008_v21, 0.0 }
 0x6e6   : > { %v2985_v2 = vadd.f32 %v2960_v5, %v2929_v60 }
 0x6e8   : > { %vm2993_vm8 = vcmp.ge.f32.partialorder %v2985_v2, 0.0  ;;  %v3001_v46 = vmul.f32 0.2, %v2985_v2 }
 0x6ea   : > { %v3009_v52 = vsel %vm2993_vm8, %v2985_v2, %v3001_v46 }
 0x6eb   : > { %v3017_v33 = vsel %vm981_vm0, %v3009_v52, 0.0  ;;  %v2771_v48 = vpop.permute.xlu0 %2770  ;;  %v2925_v17 = vpop.permute.xlu2 %2924 }
 0x6ec   : > { %v4114_v12 = vpack.c.bf16 %v3017_v33, %v3016_v10  ;;  %v2844_v32 = vadd.f32 %v2830_v57, %v2771_v48 }
 0x6ee   : > { %4140 = vst [vmem:[%s499_s22 + $0x8] sm:$0xff] %v4114_v12   ;;  %v2930_v59 = vadd.f32 %v2919_v61, %v2844_v32 }
 0x6f0   : > { %v2986_v40 = vadd.f32 %v2965_v31, %v2930_v59  ;;  %v2837_v31 = vpop.f32.mrf.mxu3 }
 0x6f2   : > { %v3002_v22 = vmul.f32 0.2, %v2986_v40  ;;  %vm2994_vm9 = vcmp.ge.f32.partialorder %v2986_v40, 0.0 }
 0x6f3   : > { %v2773_v43 = vpop.permute.xlu1 %2772  ;;  %v2921_v34 = vpop.permute.xlu0 %2920 }
 0x6f4   : > { %v2845_v30 = vadd.f32 %v2832_v1, %v2773_v43  ;;  %v2970_v24 = vpop.permute.xlu2 %2969  ;;  %v3010_v20 = vsel %vm2994_vm9, %v2986_v40, %v3002_v22 }
 0x6f5   : > { %v3018_v39 = vsel %vm981_vm0, %v3010_v20, 0.0 }
 0x6f6   : > { %v2931_v62 = vadd.f32 %v2921_v34, %v2845_v30 }
 0x6f8   : > { %v2987_v13 = vadd.f32 %v2970_v24, %v2931_v62 }
 0x6fa   : > { %vm2995_vm10 = vcmp.ge.f32.partialorder %v2987_v13, 0.0  ;;  %v3003_v50 = vmul.f32 0.2, %v2987_v13 }
 0x6fb   : > { %v2923_v16 = vpop.permute.xlu1 %2922 }
 0x6fc   : > { %v3011_v42 = vsel %vm2995_vm10, %v2987_v13, %v3003_v50  ;;  %v2932_v26 = vadd.f32 %v2923_v16, %v2846_v51 }
 0x6fd   : > { %v3019_v11 = vsel %vm981_vm0, %v3011_v42, 0.0 }
 0x6fe   : > { %v4119_v25 = vpack.c.bf16 %v3019_v11, %v3018_v39 }
 0x700   : > { %4120 = vst [vmem:[%s504_s26] sm:$0xff] %v4119_v25  }
 0x703   : > { %v2980_v5 = vpop.permute.xlu1 %2979 }
 0x704   : > { %v2777_v37 = vpop.permute.xlu0 %2776 }
 0x705   : > { %v2847_v27 = vadd.f32 %v2837_v31, %v2777_v37 }
 0x707   : > { %v2933_v45 = vadd.f32 %v2925_v17, %v2847_v27 }
 0x709   : > { %v2989_v36 = vadd.f32 %v2980_v5, %v2933_v45 }
 0x70b   : > { %v3005_v28 = vmul.f32 0.2, %v2989_v36  ;;  %vm2997_vm11 = vcmp.ge.f32.partialorder %v2989_v36, 0.0 }
 0x70c   : > { %v2975_v29 = vpop.permute.xlu0 %2974 }
 0x70d   : > { %v2988_v38 = vadd.f32 %v2975_v29, %v2932_v26  ;;  %v3013_v49 = vsel %vm2997_vm11, %v2989_v36, %v3005_v28 }
 0x70e   : > { %v3021_v19 = vsel %vm981_vm0, %v3013_v49, 0.0 }
 0x70f   : > { %vm2996_vm12 = vcmp.ge.f32.partialorder %v2988_v38, 0.0  ;;  %v3004_v47 = vmul.f32 0.2, %v2988_v38 }
 0x711   : > { %v3012_v23 = vsel %vm2996_vm12, %v2988_v38, %v3004_v47 }
 0x712   : > { %v3020_v9 = vsel %vm981_vm0, %v3012_v23, 0.0 }
 0x713   : > { %v4124_v61 = vpack.c.bf16 %v3021_v19, %v3020_v9 }
 0x715   : > { %4141 = vst [vmem:[%s504_s26 + $0x8] sm:$0xff] %v4124_v61  }
 0x716 PF: > { %s25_s29 = sadd.s32 1, %s4178_s29  }
 0x717   : > { %p22_p4 = scmp.ge.s32.totalorder %s25_s29, 4  }
 0x719   :  { %24 = sbr.rel (!%p22_p4) target bundleno = 1 (0x1), region = 136 }

</bundles_post_ra>
